<compile_context>
chip_gen: v7x
topology: tpu7x:2x2x1
jax: 0.10.0
libtpu: 0.0.40
codegen_flags: <defaults>
</compile_context>

<pallas_src>
import numpy as np

import jax
import jax.numpy as jnp
from jax.experimental import pallas as pl
from jax.experimental.pallas import tpu as pltpu


# ---------------------------------------------------------------------------
# Kernel
# ---------------------------------------------------------------------------
def _lenet_kernel(x_ref, w1_ref, b1_ref, w2_ref, b2_ref, wf_ref, bf_ref, out_ref):
    """One batch tile.

    x_ref : [7, nb, 112] bf16   (row r holds image rows 4r..4r+3 in lanes)
    out   : [nb, 128]    f32    (log-probs; first 10 lanes are real classes)
    """
    nb = x_ref.shape[1]                      # batch tile (sublane dim), %16 == 0

    def mm(a, b):
        # bf16 operands, f32 accumulation on the MXU.
        return jnp.dot(a, b, preferred_element_type=jnp.float32)

    # ---------------- conv1 (5x5, 1 -> 10): ONE matmul -----------------------
    # LHS row (g, n), g = row-quad index 0..5, covers image rows 4g..4g+7.
    xq = x_ref[...]                                            # [7, nb, 112] bf16
    lhs1 = jnp.concatenate([xq[0:6], xq[1:7]], axis=-1)        # [6, nb, 224]
    lhs1 = lhs1.reshape(6 * nb, 224)
    # Output lane = s*256 + par*128 + q*10 + c  <->  conv row 4g+s, conv col 2q+par.
    y1 = mm(lhs1, w1_ref[...]) + b1_ref[...]                   # [6*nb, 1024] f32

    # Fused 2x2 maxpool + relu: row pairs / col parity are 128-aligned lane blocks.
    top = jnp.maximum(y1[:, 0:256], y1[:, 256:512])            # pooled row 2g
    bot = jnp.maximum(y1[:, 512:768], y1[:, 768:1024])         # pooled row 2g+1
    a_top = jnp.maximum(top[:, 0:128], top[:, 128:256])        # lanes q*10+c
    a_bot = jnp.maximum(bot[:, 0:128], bot[:, 128:256])
    a1 = jnp.maximum(jnp.concatenate([a_top, a_bot], axis=-1), 0.0)   # [6*nb, 256]
    a1 = a1.astype(jnp.bfloat16).reshape(6, nb, 256)           # row g: pooled rows 2g,2g+1

    # ---------------- conv2 (5x5, 10 -> 20): ONE matmul ----------------------
    # LHS row (p2, n), p2 = output row-pair 0..3, covers pooled rows 2p2..2p2+5.
    lhs2 = jnp.concatenate([a1[0:4], a1[1:5], a1[2:6]], axis=-1)      # [4, nb, 768]
    lhs2 = lhs2.reshape(4 * nb, 768)
    # Output lane = s2*256 + par2*128 + q2*20 + co  <->  conv row 2p2+s2, col 2q2+par2.
    y2 = mm(lhs2, w2_ref[...]) + b2_ref[...]                   # [4*nb, 512] f32

    t2 = jnp.maximum(y2[:, 0:256], y2[:, 256:512])             # pool over rows
    a2 = jnp.maximum(jnp.maximum(t2[:, 0:128], t2[:, 128:256]), 0.0)  # pool over cols
    a2 = a2.astype(jnp.bfloat16).reshape(4, nb, 128)           # row h: lanes w*20+co

    # ---------------- fc (320 -> 10) + log_softmax ----------------------------
    feats = jnp.concatenate([a2[0], a2[1], a2[2], a2[3]], axis=-1)    # [nb, 512]
    logits = mm(feats, wf_ref[...]) + bf_ref[...]              # [nb, 128]; pad lanes -1e30
    m = jnp.max(logits, axis=-1, keepdims=True)
    e = jnp.exp(logits - m)
    s = jnp.sum(e, axis=-1, keepdims=True)
    out_ref[...] = logits - m - jnp.log(s)                     # lane-dense f32 store


# ---------------------------------------------------------------------------
# Weight packing (host side, tiny arrays)
# ---------------------------------------------------------------------------
def _pack_params(params):
    w1 = np.asarray(params["w1"], np.float32)   # [10, 1, 5, 5]
    b1 = np.asarray(params["b1"], np.float32)   # [10]
    w2 = np.asarray(params["w2"], np.float32)   # [20, 10, 5, 5]
    b2 = np.asarray(params["b2"], np.float32)   # [20]
    wf = np.asarray(params["wfc"], np.float32)  # [10, 320]
    bf = np.asarray(params["bfc"], np.float32)  # [10]

    C1, C2, NCLS = 10, 20, 10

    # conv1 packed weights: [224, 1024]
    #   LHS lane  kk = dr*112 + u*28 + jin     (image row 4(g+dr)+u, col jin)
    #   out  lane ll = s*256 + par*128 + q*10 + c  (conv row 4g+s, conv col 2q+par)
    w1q = np.zeros((224, 1024), np.float32)
    for dr in range(2):
        for u in range(4):
            for jin in range(28):
                kk = dr * 112 + u * 28 + jin
                for s in range(4):
                    di = 4 * dr + u - s
                    if not (0 <= di <= 4):
                        continue
                    for par in range(2):
                        for q in range(12):
                            dj = jin - (2 * q + par)
                            if not (0 <= dj <= 4):
                                continue
                            col = s * 256 + par * 128 + q * C1
                            w1q[kk, col:col + C1] = w1[:, 0, di, dj]
    b1c = np.zeros((1, 1024), np.float32)
    for s in range(4):
        for par in range(2):
            for q in range(12):
                col = s * 256 + par * 128 + q * C1
                b1c[0, col:col + C1] = b1

    # conv2 packed weights: [768, 512]
    #   LHS lane  kk = dr*256 + s1*128 + q*10 + c   (pooled row 2(p2+dr)+s1, col q, ch c)
    #   out  lane ll = s2*256 + par2*128 + q2*20 + co (conv2 row 2p2+s2, col 2q2+par2)
    w2q = np.zeros((768, 512), np.float32)
    for dr in range(3):
        for s1 in range(2):
            for q in range(12):
                for c in range(C1):
                    kk = dr * 256 + s1 * 128 + q * C1 + c
                    for s2 in range(2):
                        di = 2 * dr + s1 - s2
                        if not (0 <= di <= 4):
                            continue
                        for par2 in range(2):
                            for q2 in range(4):
                                dj = q - (2 * q2 + par2)
                                if not (0 <= dj <= 4):
                                    continue
                                col = s2 * 256 + par2 * 128 + q2 * C2
                                w2q[kk, col:col + C2] = w2[:, c, di, dj]
    b2c = np.zeros((1, 512), np.float32)
    for s2 in range(2):
        for par2 in range(2):
            for q2 in range(4):
                col = s2 * 256 + par2 * 128 + q2 * C2
                b2c[0, col:col + C2] = b2

    # fc packed weights: [512, 128]
    #   feats lane = h*128 + w*20 + co   <->   torch flat index f = co*16 + h*4 + w
    wfcF = np.zeros((512, 128), np.float32)
    for h in range(4):
        for w in range(4):
            for co in range(C2):
                row = h * 128 + w * C2 + co
                f = co * 16 + h * 4 + w
                wfcF[row, :NCLS] = wf[:, f]
    bfc = np.full((1, 128), -1e30, np.float32)      # pad class lanes -> -inf-like (f32)
    bfc[0, :NCLS] = bf

    return dict(
        w1q=jnp.asarray(w1q).astype(jnp.bfloat16),
        b1c=jnp.asarray(b1c),                       # biases stay f32
        w2q=jnp.asarray(w2q).astype(jnp.bfloat16),
        b2c=jnp.asarray(b2c),
        wfc=jnp.asarray(wfcF).astype(jnp.bfloat16),
        bfc=jnp.asarray(bfc),
    )


# ---------------------------------------------------------------------------
# Wrapper
# ---------------------------------------------------------------------------
def net_forward(x, params, *, batch_tile=64, interpret=False):
    """x: [N, 1, 28, 28] float -> log_softmax logits [N, 10] (matches PyTorch Net)."""
    n = int(x.shape[0])
    nb = int(batch_tile)
    assert nb % 16 == 0, "batch_tile must be a multiple of 16 (bf16 sublane tile)"
    n_pad = -(-n // nb) * nb

    # [N,1,28,28] -> [N,7,112] (4 image rows per lane row) -> [7, Npad, 112] bf16.
    xr = jnp.asarray(x, jnp.float32).reshape(n, 7, 112)
    if n_pad != n:
        xr = jnp.concatenate(
            [xr, jnp.zeros((n_pad - n, 7, 112), jnp.float32)], axis=0)
    xT = jnp.transpose(xr, (1, 0, 2)).astype(jnp.bfloat16)     # [7, Npad, 112]

    p = _pack_params(params)

    out = pl.pallas_call(
        _lenet_kernel,
        out_shape=jax.ShapeDtypeStruct((n_pad, 128), jnp.float32),
        grid=(n_pad // nb,),
        in_specs=[
            pl.BlockSpec((7, nb, 112), lambda b: (0, b, 0)),   # input batch tile
            pl.BlockSpec((224, 1024), lambda b: (0, 0)),       # conv1 packed weights
            pl.BlockSpec((1, 1024), lambda b: (0, 0)),         # conv1 bias
            pl.BlockSpec((768, 512), lambda b: (0, 0)),        # conv2 packed weights
            pl.BlockSpec((1, 512), lambda b: (0, 0)),          # conv2 bias
            pl.BlockSpec((512, 128), lambda b: (0, 0)),        # fc packed weights
            pl.BlockSpec((1, 128), lambda b: (0, 0)),          # fc bias (-1e30 pads)
        ],
        out_specs=pl.BlockSpec((nb, 128), lambda b: (b, 0)),
        compiler_params=pltpu.CompilerParams(
            dimension_semantics=("parallel",),        # batch tiles -> megacore on v7x
            vmem_limit_bytes=32 * 1024 * 1024,        # explicit budget, valid on v7x
        ),
        interpret=interpret,
    )(xT, p["w1q"], p["b1c"], p["w2q"], p["b2c"], p["wfc"], p["bfc"])

    return out[:n, :10]


# ---------------------------------------------------------------------------
# Pure-numpy (float64) reference of the PyTorch forward
# ---------------------------------------------------------------------------
def _reference_forward(x, params):
    x = np.asarray(x, np.float64)
    w1 = np.asarray(params["w1"], np.float64)
    b1 = np.asarray(params["b1"], np.float64)
    w2 = np.asarray(params["w2"], np.float64)
    b2 = np.asarray(params["b2"], np.float64)
    wf = np.asarray(params["wfc"], np.float64)
    bf = np.asarray(params["bfc"], np.float64)

    def conv2d(inp, w, b):
        n_, ci, h, wd = inp.shape
        co, _, kk, _ = w.shape
        ho, wo = h - kk + 1, wd - kk + 1
        out = np.zeros((n_, co, ho, wo), np.float64)
        for di in range(kk):
            for dj in range(kk):
                out += np.einsum("ncij,oc->noij",
                                 inp[:, :, di:di + ho, dj:dj + wo], w[:, :, di, dj])
        return out + b[None, :, None, None]

    def maxpool2(t):
        n_, c, h, wd = t.shape
        return t.reshape(n_, c, h // 2, 2, wd // 2, 2).max(axis=(3, 5))

    a1 = np.maximum(maxpool2(conv2d(x, w1, b1)), 0.0)
    a2 = np.maximum(maxpool2(conv2d(a1, w2, b2)), 0.0)
    feats = a2.reshape(x.shape[0], -1)
    logits = feats @ wf.T + bf
    m = logits.max(axis=1, keepdims=True)
    return logits - m - np.log(np.exp(logits - m).sum(axis=1, keepdims=True))


# ---------------------------------------------------------------------------
if __name__ == "__main__":
    key = jax.random.PRNGKey(0)
    ks = jax.random.split(key, 7)

    N = 28
    x = jax.random.normal(ks[0], (N, 1, 28, 28), jnp.float32)
    params = {
        "w1": jax.random.normal(ks[1], (10, 1, 5, 5), jnp.float32) * 0.2,
        "b1": jax.random.normal(ks[2], (10,), jnp.float32) * 0.1,
        "w2": jax.random.normal(ks[3], (20, 10, 5, 5), jnp.float32) * 0.06,
        "b2": jax.random.normal(ks[4], (20,), jnp.float32) * 0.1,
        "wfc": jax.random.normal(ks[5], (10, 320), jnp.float32) * 0.05,
        "bfc": jax.random.normal(ks[6], (10,), jnp.float32) * 0.1,
    }

    out = net_forward(x, params, batch_tile=16)       # padded to 32 -> grid of 2 tiles
    out = jax.block_until_ready(out)

    ref = _reference_forward(np.asarray(x), params)
    out_np = np.asarray(out)

    assert out_np.shape == (N, 10)
    assert np.isfinite(out_np).all()
    err = float(np.max(np.abs(out_np - ref)))
    # bf16 MXU operands with f32 accumulation: ~1e-2 typical deviation vs float64.
    assert err < 1e-1, f"mismatch vs reference: max abs err {err}"

    print("KERNEL_OK")
</pallas_src>

<mosaic_0001>
module attributes {stable_mosaic.version = 11 : i64} {
  func.func @_lenet_kernel(%arg0: i32, %arg1: memref<7x16x112xbf16, #tpu.memory_space<vmem>>, %arg2: memref<224x1024xbf16, #tpu.memory_space<vmem>>, %arg3: memref<1x1024xf32, #tpu.memory_space<vmem>>, %arg4: memref<768x512xbf16, #tpu.memory_space<vmem>>, %arg5: memref<1x512xf32, #tpu.memory_space<vmem>>, %arg6: memref<512x128xbf16, #tpu.memory_space<vmem>>, %arg7: memref<1x128xf32, #tpu.memory_space<vmem>>, %arg8: memref<16x128xf32, #tpu.memory_space<vmem>>) attributes {dimension_semantics = [#tpu.dimension_semantics<parallel>], iteration_bounds = array<i64: 2>, scalar_prefetch = 0 : i64, scratch_operands = 0 : i64, tpu.core_type = #tpu.core_type<tc>, window_params = [{transform_indices = @transform_0, window_bounds = array<i64: 7, 16, 112>}, {pipeline_mode = #tpu.pipeline_mode<synchronous>, transform_indices = @transform_1, window_bounds = array<i64: 224, 1024>}, {pipeline_mode = #tpu.pipeline_mode<synchronous>, transform_indices = @transform_2, window_bounds = array<i64: 1, 1024>}, {pipeline_mode = #tpu.pipeline_mode<synchronous>, transform_indices = @transform_3, window_bounds = array<i64: 768, 512>}, {pipeline_mode = #tpu.pipeline_mode<synchronous>, transform_indices = @transform_4, window_bounds = array<i64: 1, 512>}, {pipeline_mode = #tpu.pipeline_mode<synchronous>, transform_indices = @transform_5, window_bounds = array<i64: 512, 128>}, {pipeline_mode = #tpu.pipeline_mode<synchronous>, transform_indices = @transform_6, window_bounds = array<i64: 1, 128>}, {transform_indices = @transform_7, window_bounds = array<i64: 16, 128>}]} {
    %c0 = arith.constant 0 : index
    %c0_0 = arith.constant 0 : index
    %c0_1 = arith.constant 0 : index
    %0 = vector.load %arg1[%c0, %c0_0, %c0_1] : memref<7x16x112xbf16, #tpu.memory_space<vmem>>, vector<7x16x112xbf16>
    %1 = vector.extract_strided_slice %0 {offsets = [0, 0, 0], sizes = [6, 16, 112], strides = [1, 1, 1]} : vector<7x16x112xbf16> to vector<6x16x112xbf16>
    %2 = vector.extract_strided_slice %0 {offsets = [1, 0, 0], sizes = [6, 16, 112], strides = [1, 1, 1]} : vector<7x16x112xbf16> to vector<6x16x112xbf16>
    %3 = tpu.concatenate %1, %2 in 2 : vector<6x16x112xbf16>, vector<6x16x112xbf16> -> vector<6x16x224xbf16>
    %4 = vector.shape_cast %3 : vector<6x16x224xbf16> to vector<96x224xbf16>
    %c0_2 = arith.constant 0 : index
    %c0_3 = arith.constant 0 : index
    %5 = vector.load %arg2[%c0_2, %c0_3] : memref<224x1024xbf16, #tpu.memory_space<vmem>>, vector<224x1024xbf16>
    %cst = arith.constant dense<0.000000e+00> : vector<96x1024xf32>
    %6 = tpu.matmul %4, %5, %cst {dimension_numbers = #tpu.dot_dimension_numbers<[1], [0], [0], [1], [0, 0, 1, 1], [], []>} : vector<96x224xbf16>, vector<224x1024xbf16>, vector<96x1024xf32> -> vector<96x1024xf32>
    %c0_4 = arith.constant 0 : index
    %c0_5 = arith.constant 0 : index
    %7 = vector.load %arg3[%c0_4, %c0_5] : memref<1x1024xf32, #tpu.memory_space<vmem>>, vector<1x1024xf32>
    %8 = vector.broadcast %7 : vector<1x1024xf32> to vector<96x1024xf32>
    %9 = arith.addf %6, %8 : vector<96x1024xf32>
    %10 = vector.extract_strided_slice %9 {offsets = [0, 0], sizes = [96, 256], strides = [1, 1]} : vector<96x1024xf32> to vector<96x256xf32>
    %11 = vector.extract_strided_slice %9 {offsets = [0, 256], sizes = [96, 256], strides = [1, 1]} : vector<96x1024xf32> to vector<96x256xf32>
    %12 = arith.maximumf %10, %11 : vector<96x256xf32>
    %13 = vector.extract_strided_slice %9 {offsets = [0, 512], sizes = [96, 256], strides = [1, 1]} : vector<96x1024xf32> to vector<96x256xf32>
    %14 = vector.extract_strided_slice %9 {offsets = [0, 768], sizes = [96, 256], strides = [1, 1]} : vector<96x1024xf32> to vector<96x256xf32>
    %15 = arith.maximumf %13, %14 : vector<96x256xf32>
    %16 = vector.extract_strided_slice %12 {offsets = [0, 0], sizes = [96, 128], strides = [1, 1]} : vector<96x256xf32> to vector<96x128xf32>
    %17 = vector.extract_strided_slice %12 {offsets = [0, 128], sizes = [96, 128], strides = [1, 1]} : vector<96x256xf32> to vector<96x128xf32>
    %18 = arith.maximumf %16, %17 : vector<96x128xf32>
    %19 = vector.extract_strided_slice %15 {offsets = [0, 0], sizes = [96, 128], strides = [1, 1]} : vector<96x256xf32> to vector<96x128xf32>
    %20 = vector.extract_strided_slice %15 {offsets = [0, 128], sizes = [96, 128], strides = [1, 1]} : vector<96x256xf32> to vector<96x128xf32>
    %21 = arith.maximumf %19, %20 : vector<96x128xf32>
    %22 = tpu.concatenate %18, %21 in 1 : vector<96x128xf32>, vector<96x128xf32> -> vector<96x256xf32>
    %cst_6 = arith.constant 0.000000e+00 : f32
    %23 = vector.broadcast %cst_6 : f32 to vector<96x256xf32>
    %24 = arith.maximumf %22, %23 : vector<96x256xf32>
    %25 = arith.truncf %24 : vector<96x256xf32> to vector<96x256xbf16>
    %26 = vector.shape_cast %25 : vector<96x256xbf16> to vector<6x16x256xbf16>
    %27 = vector.extract_strided_slice %26 {offsets = [0, 0, 0], sizes = [4, 16, 256], strides = [1, 1, 1]} : vector<6x16x256xbf16> to vector<4x16x256xbf16>
    %28 = vector.extract_strided_slice %26 {offsets = [1, 0, 0], sizes = [4, 16, 256], strides = [1, 1, 1]} : vector<6x16x256xbf16> to vector<4x16x256xbf16>
    %29 = vector.extract_strided_slice %26 {offsets = [2, 0, 0], sizes = [4, 16, 256], strides = [1, 1, 1]} : vector<6x16x256xbf16> to vector<4x16x256xbf16>
    %30 = tpu.concatenate %27, %28, %29 in 2 : vector<4x16x256xbf16>, vector<4x16x256xbf16>, vector<4x16x256xbf16> -> vector<4x16x768xbf16>
    %31 = vector.shape_cast %30 : vector<4x16x768xbf16> to vector<64x768xbf16>
    %c0_7 = arith.constant 0 : index
    %c0_8 = arith.constant 0 : index
    %32 = vector.load %arg4[%c0_7, %c0_8] : memref<768x512xbf16, #tpu.memory_space<vmem>>, vector<768x512xbf16>
    %cst_9 = arith.constant dense<0.000000e+00> : vector<64x512xf32>
    %33 = tpu.matmul %31, %32, %cst_9 {dimension_numbers = #tpu.dot_dimension_numbers<[1], [0], [0], [1], [0, 0, 1, 1], [], []>} : vector<64x768xbf16>, vector<768x512xbf16>, vector<64x512xf32> -> vector<64x512xf32>
    %c0_10 = arith.constant 0 : index
    %c0_11 = arith.constant 0 : index
    %34 = vector.load %arg5[%c0_10, %c0_11] : memref<1x512xf32, #tpu.memory_space<vmem>>, vector<1x512xf32>
    %35 = vector.broadcast %34 : vector<1x512xf32> to vector<64x512xf32>
    %36 = arith.addf %33, %35 : vector<64x512xf32>
    %37 = vector.extract_strided_slice %36 {offsets = [0, 0], sizes = [64, 256], strides = [1, 1]} : vector<64x512xf32> to vector<64x256xf32>
    %38 = vector.extract_strided_slice %36 {offsets = [0, 256], sizes = [64, 256], strides = [1, 1]} : vector<64x512xf32> to vector<64x256xf32>
    %39 = arith.maximumf %37, %38 : vector<64x256xf32>
    %40 = vector.extract_strided_slice %39 {offsets = [0, 0], sizes = [64, 128], strides = [1, 1]} : vector<64x256xf32> to vector<64x128xf32>
    %41 = vector.extract_strided_slice %39 {offsets = [0, 128], sizes = [64, 128], strides = [1, 1]} : vector<64x256xf32> to vector<64x128xf32>
    %42 = arith.maximumf %40, %41 : vector<64x128xf32>
    %cst_12 = arith.constant 0.000000e+00 : f32
    %43 = vector.broadcast %cst_12 : f32 to vector<64x128xf32>
    %44 = arith.maximumf %42, %43 : vector<64x128xf32>
    %45 = arith.truncf %44 : vector<64x128xf32> to vector<64x128xbf16>
    %46 = vector.shape_cast %45 : vector<64x128xbf16> to vector<4x16x128xbf16>
    %47 = vector.extract_strided_slice %46 {offsets = [0, 0, 0], sizes = [1, 16, 128], strides = [1, 1, 1]} : vector<4x16x128xbf16> to vector<1x16x128xbf16>
    %48 = vector.shape_cast %47 : vector<1x16x128xbf16> to vector<16x128xbf16>
    %49 = vector.extract_strided_slice %46 {offsets = [1, 0, 0], sizes = [1, 16, 128], strides = [1, 1, 1]} : vector<4x16x128xbf16> to vector<1x16x128xbf16>
    %50 = vector.shape_cast %49 : vector<1x16x128xbf16> to vector<16x128xbf16>
    %51 = vector.extract_strided_slice %46 {offsets = [2, 0, 0], sizes = [1, 16, 128], strides = [1, 1, 1]} : vector<4x16x128xbf16> to vector<1x16x128xbf16>
    %52 = vector.shape_cast %51 : vector<1x16x128xbf16> to vector<16x128xbf16>
    %53 = vector.extract_strided_slice %46 {offsets = [3, 0, 0], sizes = [1, 16, 128], strides = [1, 1, 1]} : vector<4x16x128xbf16> to vector<1x16x128xbf16>
    %54 = vector.shape_cast %53 : vector<1x16x128xbf16> to vector<16x128xbf16>
    %55 = tpu.concatenate %48, %50, %52, %54 in 1 : vector<16x128xbf16>, vector<16x128xbf16>, vector<16x128xbf16>, vector<16x128xbf16> -> vector<16x512xbf16>
    %c0_13 = arith.constant 0 : index
    %c0_14 = arith.constant 0 : index
    %56 = vector.load %arg6[%c0_13, %c0_14] : memref<512x128xbf16, #tpu.memory_space<vmem>>, vector<512x128xbf16>
    %cst_15 = arith.constant dense<0.000000e+00> : vector<16x128xf32>
    %57 = tpu.matmul %55, %56, %cst_15 {dimension_numbers = #tpu.dot_dimension_numbers<[1], [0], [0], [1], [0, 0, 1, 1], [], []>} : vector<16x512xbf16>, vector<512x128xbf16>, vector<16x128xf32> -> vector<16x128xf32>
    %c0_16 = arith.constant 0 : index
    %c0_17 = arith.constant 0 : index
    %58 = vector.load %arg7[%c0_16, %c0_17] : memref<1x128xf32, #tpu.memory_space<vmem>>, vector<1x128xf32>
    %59 = vector.broadcast %58 : vector<1x128xf32> to vector<16x128xf32>
    %60 = arith.addf %57, %59 : vector<16x128xf32>
    %cst_18 = arith.constant dense<0xFF800000> : vector<16xf32>
    %61 = vector.multi_reduction <maximumf>, %60, %cst_18 [1] : vector<16x128xf32> to vector<16xf32>
    %62 = vector.shape_cast %61 : vector<16xf32> to vector<16x1xf32>
    %63 = vector.broadcast %62 : vector<16x1xf32> to vector<16x128xf32>
    %64 = arith.subf %60, %63 : vector<16x128xf32>
    %65 = math.exp %64 : vector<16x128xf32>
    %cst_19 = arith.constant dense<0.000000e+00> : vector<16xf32>
    %66 = vector.multi_reduction <add>, %65, %cst_19 [1] : vector<16x128xf32> to vector<16xf32>
    %67 = vector.shape_cast %66 : vector<16xf32> to vector<16x1xf32>
    %68 = vector.broadcast %62 : vector<16x1xf32> to vector<16x128xf32>
    %69 = arith.subf %60, %68 : vector<16x128xf32>
    %70 = math.log %67 : vector<16x1xf32>
    %71 = vector.broadcast %70 : vector<16x1xf32> to vector<16x128xf32>
    %72 = arith.subf %69, %71 : vector<16x128xf32>
    %c0_20 = arith.constant 0 : index
    %c0_21 = arith.constant 0 : index
    %73 = vector.load %arg8[%c0_20, %c0_21] : memref<16x128xf32, #tpu.memory_space<vmem>>, vector<16x128xf32>
    tpu.vector_store %arg8[%c0_20, %c0_21], %72 {strides = array<i32>} : memref<16x128xf32, #tpu.memory_space<vmem>>, vector<16x128xf32>,
    return
  }
  func.func @transform_0(%arg0: i32) -> (i32, i32, i32) {
    %c0_i32 = arith.constant 0 : i32
    %c0_i32_0 = arith.constant 0 : i32
    %c0_i32_1 = arith.constant 0 : i32
    return %c0_i32, %arg0, %c0_i32_0 : i32, i32, i32
  }
  func.func @transform_1(%arg0: i32) -> (i32, i32) {
    %c0_i32 = arith.constant 0 : i32
    %c0_i32_0 = arith.constant 0 : i32
    %c0_i32_1 = arith.constant 0 : i32
    return %c0_i32, %c0_i32_0 : i32, i32
  }
  func.func @transform_2(%arg0: i32) -> (i32, i32) {
    %c0_i32 = arith.constant 0 : i32
    %c0_i32_0 = arith.constant 0 : i32
    %c0_i32_1 = arith.constant 0 : i32
    return %c0_i32, %c0_i32_0 : i32, i32
  }
  func.func @transform_3(%arg0: i32) -> (i32, i32) {
    %c0_i32 = arith.constant 0 : i32
    %c0_i32_0 = arith.constant 0 : i32
    %c0_i32_1 = arith.constant 0 : i32
    return %c0_i32, %c0_i32_0 : i32, i32
  }
  func.func @transform_4(%arg0: i32) -> (i32, i32) {
    %c0_i32 = arith.constant 0 : i32
    %c0_i32_0 = arith.constant 0 : i32
    %c0_i32_1 = arith.constant 0 : i32
    return %c0_i32, %c0_i32_0 : i32, i32
  }
  func.func @transform_5(%arg0: i32) -> (i32, i32) {
    %c0_i32 = arith.constant 0 : i32
    %c0_i32_0 = arith.constant 0 : i32
    %c0_i32_1 = arith.constant 0 : i32
    return %c0_i32, %c0_i32_0 : i32, i32
  }
  func.func @transform_6(%arg0: i32) -> (i32, i32) {
    %c0_i32 = arith.constant 0 : i32
    %c0_i32_0 = arith.constant 0 : i32
    %c0_i32_1 = arith.constant 0 : i32
    return %c0_i32, %c0_i32_0 : i32, i32
  }
  func.func @transform_7(%arg0: i32) -> (i32, i32) {
    %c0_i32 = arith.constant 0 : i32
    %c0_i32_0 = arith.constant 0 : i32
    return %arg0, %c0_i32 : i32, i32
  }
}

</mosaic_0001>

<bundles_post_ra>
// kernel: tpu_custom_call.1
= control target key start
LH: loop header
LB: loop body
LE: loop exit
PB: predicated region body
PF: predicated region fallthrough
CT: control target
= control target key end

     0   :  { %s5683_s0 = inlined_call_operand.hbm [shape: bf16[7,32,112], index: 0, kind: input, shape index: {}]   ;;  %s5684_s1 = inlined_call_operand.hbm [shape: bf16[224,1024], index: 1, kind: input, shape index: {}]   ;;  %s5685_s2 = inlined_call_operand.hbm [shape: f32[1,1024], index: 2, kind: input, shape index: {}]   ;;  %s5686_s3 = inlined_call_operand.hbm [shape: bf16[768,512], index: 3, kind: input, shape index: {}]   ;;  %s5687_s4 = inlined_call_operand.vmem [shape: f32[1,512], index: 4, kind: input, shape index: {}]   ;;  %s5688_s5 = inlined_call_operand.hbm [shape: bf16[512,128], index: 5, kind: input, shape index: {}]   ;;  %s5689_s6 = inlined_call_operand.vmem [shape: f32[1,128], index: 6, kind: input, shape index: {}]   ;;  %s5690_s7 = inlined_call_operand.hbm [shape: f32[32,128], index: 7, kind: output, shape index: {}]  }
   0x1   :  { %5703 = sst [smem:[#allocation24_spill]] %s5684_s1 }
   0x2   :  { %5704 = sst [smem:[#allocation25_spill]] %s5690_s7 }
   0x3   :  { %12 = vsyncpa [#allocation3], 0 }
   0x4   :  { %14 = vsyncpa [#allocation3 + $0x1], 0 }
   0x5   :  { %15 = vsyncpa [#allocation6], 0 }
   0x6   :  { %16 = vsyncpa [#allocation9], 0 }
   0x7   :  { %17 = vsyncpa [#allocation4], 0 }
   0x8   :  { %19 = vsyncpa [#allocation4 + $0x1], 0  ;;  %s5039_s24 = smov 0   ;;  %s5041_s25 = smov 0  }
   0x9   :  { %s5043_s26 = smov 0   ;;  %s5045_s27 = smov 0  }
   0xa LB: > { %5705 = sst [smem:[#allocation19_spill]] %s4965_s24  ;;  %s5060_s28 = sadd.s32 4294967295, %s4977_s27   ;;  %s4977_s27 = sphi %s5045_s27, %s5731_s27   ;;  %s4973_s26 = sphi %s5043_s26, %s5735_s26   ;;  %s4969_s25 = sphi %s5041_s25, %s5734_s25   ;;  %s4965_s24 = sphi %s5039_s24, %s5733_s24  }
   0xb   : > { %s3814_s29 = sadd.s32 4294967294, %s4977_s27   ;;  %s5064_s30 = sadd.s32 1, %s4977_s27  }
   0xc   : > { %5706 = sst [smem:[#allocation20_spill]] %s5064_s30  ;;  %s32_s8 = sadd.s32 1, %s4973_s26 }
   0xd   : > { %s29_s9 = ssub.s32 %s4977_s27, %s5064_s30  ;;  %p39_p0 = scmp.ne.s32.totalorder %s4973_s26, %s4969_s25 }
   0xe   : > { %p30_p1 = scmp.eq.s32.totalorder %s29_s9, 0  ;;  %p40_p2 = scmp.eq.s32.totalorder %s4977_s27, 0 }
   0xf   : > { %p45_p3 = scmp.ne.s32.totalorder %s4969_s25, %s4965_s24  ;;  %p5691_p4 = scmp.eq.s32.totalorder %s5060_s28, 0 }
  0x10   : > { %s5076_s10 = scalar_select %p30_p1, %s4973_s26, %s32_s8  }
  0x11   : > { %p5078_p5 = por %p40_p2, %p39_p0  ;;  %p5084_p6 = por %p5691_p4, %p45_p3 }
  0x12   : > { %5707 = sst [smem:[#allocation21_spill]] %s5076_s10  ;;  %p195_p7 = scmp.eq.s32.totalorder %s5060_s28, 1 }
  0x13   : > { %s5708_s11 = scalar_select %p5078_p5, 1, 0 }
  0x14   : > { %s5709_s12 = scalar_select %p5084_p6, 1, 0 }
  0x15   : > { %p201_p8 = scmp.eq.s32.totalorder %s3814_s29, 1  ;;  %p3815_p9 = scmp.ge.s32.totalorder %s4977_s27, 1 }
  0x16   : > { %p208_p10 = scmp.lt.s32.totalorder %s4977_s27, 3  ;;  %p5091_p11 = por %p195_p7, %p39_p0 }
  0x17   : > { %p5095_p12 = por %p201_p8, %p45_p3  ;;  %s4979_s16 = smov [#allocation5]  }
  0x18   : > { %s5710_s13 = scalar_select %p5091_p11, 1, 0 }
  0x19   : > { %s5712_s14 = scalar_select %p5095_p12, 1, 0 }
  0x1a   : > { %5711 = sst [smem:[#allocation22_spill]] %s5710_s13  ;;  %p5099_p13 = pnand %p3815_p9, %p208_p10 }
  0x1b   : > { %5713 = sst [smem:[#allocation23_spill]] %s5712_s14  ;;  %s220_s17 = sshll.u32 %s4979_s16, 4  ;;  %s221_s17 = int_to_ptr.vmem [resolvable:$true] %s220_s17 }
  0x1c   : > { %s5714_s15 = scalar_select %p5099_p13, 1, 0 }
  0x1d   : > { %p4375_p1 = pneg %p5099_p13  ;;  %s4980_s19 = smov [#allocation8]  }
  0x1e   : > { %s244_s20 = sshll.u32 %s4980_s19, 4  ;;  %s5716_s1 = sld [smem:[#allocation24_spill]]  ;;  %s5111_s20 = int_to_ptr.vmem [resolvable:$true] %s244_s20 }
  0x1f   : > { %p5107_p2 = pnand %p4375_p1, %p5691_p4 }
  0x21   : > { %p5121_p3 = pneg %p5107_p2 }
  0x24   : > { %s4791_s23 = scalar_lea.hbm %s5716_s1, 14336 }
  0x25   : > { %p4792_p0 = scmp.ne.s32.totalorder %s5716_s1, %s4791_s23  ;;  %p4798_p9 = scmp.lt.u32.totalorder %s4791_s23, %s5716_s1 }
  0x27   : > { %p4794_p7 = pnand %p5121_p3, %p4792_p0 }
  0x29   : > { %p4795_p8 = pneg %p4794_p7 }
  0x2b   : > { %p4800_p10 = pnand %p4798_p9, %p4795_p8 }
  0x2d   : > { %4803 = shalt.err (!%p4800_p10)
}
  0x2e   : > { %s4804_s21 = scalar_lea.vmem %s221_s17, 14336  ;;  %p4812_p11 = scmp.lt.s32.totalorder %s221_s17, %s221_s17 }
  0x2f   : > { %p4805_p1 = scmp.ne.s32.totalorder %s221_s17, %s4804_s21  ;;  %p4813_p6 = scmp.lt.s32.totalorder %s4804_s21, %s4804_s21 }
  0x31   : > { %p4807_p4 = pnand %p4805_p1, %p5121_p3  ;;  %p4814_p13 = por %p4813_p6, %p4812_p11 }
  0x33   : > { %p4808_p12 = pneg %p4807_p4 }
  0x35   : > { %p4815_p5 = pnand %p4814_p13, %p4808_p12 }
  0x37   : > { %4818 = shalt.err (!%p4815_p5)
}
  0x38   : > { %s4981_s22 = smov 512   ;;  %s4982_s29 = smov 32  }
  0x39   : > { %4378 = dma.hbm_to_vmem [thread:$0]  (!%p5107_p2), %s5716_s1, 14336, %s221_s17, [#allocation6], %s4981_s22, %s4981_s22, %s4982_s29  }
  0x3a   : > { %s4819_s10 = scalar_lea.hbm %s5686_s3, 24576 }
  0x3b   : > { %p4820_p4 = scmp.ne.s32.totalorder %s5686_s3, %s4819_s10  ;;  %p4826_p11 = scmp.lt.u32.totalorder %s4819_s10, %s5686_s3 }
  0x3d   : > { %p4822_p6 = pnand %p4820_p4, %p5121_p3 }
  0x3f   : > { %p4823_p5 = pneg %p4822_p6 }
  0x41   : > { %p4828_p12 = pnand %p4826_p11, %p4823_p5 }
  0x43   : > { %4831 = shalt.err (!%p4828_p12)
}
  0x44   : > { %s4832_s17 = scalar_lea.vmem %s5111_s20, 24576  ;;  %p4840_p8 = scmp.lt.s32.totalorder %s5111_s20, %s5111_s20 }
  0x45   : > { %p4833_p13 = scmp.ne.s32.totalorder %s5111_s20, %s4832_s17  ;;  %p4841_p9 = scmp.lt.s32.totalorder %s4832_s17, %s4832_s17 }
  0x47   : > { %p4835_p0 = pnand %p4833_p13, %p5121_p3  ;;  %p4842_p10 = por %p4841_p9, %p4840_p8 }
  0x49   : > { %p4836_p7 = pneg %p4835_p0 }
  0x4b   : > { %p4843_p1 = pnand %p4842_p10, %p4836_p7 }
  0x4d   : > { %4846 = shalt.err (!%p4843_p1)
}
  0x4e   : > { %s4983_s30 = smov 256   ;;  %s4984_s24 = smov 16  }
  0x4f   : > { %4384 = dma.hbm_to_vmem [thread:$0]  (!%p5107_p2), %s5686_s3, 24576, %s5111_s20, [#allocation9], %s4983_s30, %s4983_s30, %s4984_s24  }
  0x50   : > { %s4985_s22 = smov [#allocation7]   ;;  %s4986_s8 = smov [#allocation10]  }
  0x51   : > { %s234_s29 = sshll.u32 %s4985_s22, 4  ;;  %s260_s23 = sshll.u32 %s4986_s8, 4  ;;  %s235_s29 = int_to_ptr.vmem [resolvable:$true] %s234_s29  ;;  %s261_s23 = int_to_ptr.vmem [resolvable:$true] %s260_s23 }
  0x52   : > { %s4847_s21 = scalar_lea.hbm %s5685_s2, 128 }
  0x53   : > { %p4848_p4 = scmp.ne.s32.totalorder %s5685_s2, %s4847_s21  ;;  %p4854_p11 = scmp.lt.u32.totalorder %s4847_s21, %s5685_s2 }
  0x55   : > { %p4850_p6 = pnand %p4848_p4, %p5121_p3 }
  0x57   : > { %p4851_p5 = pneg %p4850_p6 }
  0x59   : > { %p4856_p12 = pnand %p4854_p11, %p4851_p5 }
  0x5b   : > { %4859 = shalt.err (!%p4856_p12)
}
  0x5c   : > { %s4860_s20 = scalar_lea.vmem %s235_s29, 128  ;;  %p4868_p8 = scmp.lt.s32.totalorder %s235_s29, %s235_s29 }
  0x5d   : > { %p4861_p13 = scmp.ne.s32.totalorder %s235_s29, %s4860_s20  ;;  %p4869_p9 = scmp.lt.s32.totalorder %s4860_s20, %s4860_s20 }
  0x5f   : > { %p4863_p0 = pnand %p4861_p13, %p5121_p3  ;;  %p4870_p10 = por %p4869_p9, %p4868_p8 }
  0x61   : > { %p4864_p7 = pneg %p4863_p0 }
  0x63   : > { %p4871_p1 = pnand %p4870_p10, %p4864_p7 }
  0x65   : > { %4874 = shalt.err (!%p4871_p1)
}
  0x66   : > { %4381 = dma.hbm_to_vmem [thread:$0]  (!%p5107_p2), %s5685_s2, 128, %s235_s29, [#allocation6]  }
  0x67   : > { %s4875_s24 = scalar_lea.hbm %s5688_s5, 4096 }
  0x68   : > { %p4876_p4 = scmp.ne.s32.totalorder %s5688_s5, %s4875_s24  ;;  %p4882_p11 = scmp.lt.u32.totalorder %s4875_s24, %s5688_s5 }
  0x6a   : > { %p4878_p6 = pnand %p4876_p4, %p5121_p3 }
  0x6c   : > { %p4879_p5 = pneg %p4878_p6 }
  0x6e   : > { %p4884_p12 = pnand %p4882_p11, %p4879_p5 }
  0x70   : > { %4887 = shalt.err (!%p4884_p12)
}
  0x71   : > { %s4888_s16 = scalar_lea.vmem %s261_s23, 4096  ;;  %p4896_p8 = scmp.lt.s32.totalorder %s261_s23, %s261_s23 }
  0x72   : > { %p4889_p13 = scmp.ne.s32.totalorder %s261_s23, %s4888_s16  ;;  %p4897_p9 = scmp.lt.s32.totalorder %s4888_s16, %s4888_s16 }
  0x74   : > { %p4891_p0 = pnand %p4889_p13, %p5121_p3  ;;  %p4898_p10 = por %p4897_p9, %p4896_p8 }
  0x76   : > { %p4892_p7 = pneg %p4891_p0 }
  0x78   : > { %p4899_p1 = pnand %p4898_p10, %p4892_p7 }
  0x7a   : > { %4902 = shalt.err (!%p4899_p1)
}
  0x7b   : > { %s4987_s29 = smov 64   ;;  %s4988_s19 = smov 4  }
  0x7c   : > { %4387 = dma.hbm_to_vmem [thread:$0]  (!%p5107_p2), %s5688_s5, 4096, %s261_s23, [#allocation9], %s4987_s29, %s4987_s29, %s4988_s19  }
  0x7d   : > { %p3820_p4 = scmp.ge.s32.totalorder %s4977_s27, 2 }
  0x7f   : > { %273 = sbr.rel (%p3820_p4) target bundleno = 150 (0x96), region = 40 }
  0x86   : > { %s277_s9 = sand.u32 1, %s4973_s26   ;;  %s4204_s18 = sshll.u32 %s4977_s27, 7 }
  0x87   : > { %s4346_s20 = smul.u32 56, %s277_s9  ;;  %s4989_s1 = smov 256  }
  0x88   : > { %p5718_p3 = scmp.ne.s32.totalorder %s5708_s11, 0  ;;  %s287_s13 = scalar_lea.hbm %s5683_s0, %s4204_s18 }
  0x89   : > { %s281_s10 = scalar_lea.vmem [#allocation2], %s4346_s20  ;;  %s4990_s22 = smov 128  }
  0x8a   : > { %4357 = sst [smem:[#allocation13]] (%p5718_p3), %s4989_s1  ;;  %s300_s14 = sshll.u32 %s281_s10, 4  ;;  %s301_s14 = int_to_ptr.vmem [resolvable:$true] %s300_s14 }
  0x8b   : > { %s4356_s23 = scalar_select %p5718_p3, [#allocation0], [#allocation14] }
  0x8c   : > { %4358 = sst [smem:[#allocation13 + $0x1]] (%p5718_p3), %s4990_s22  ;;  %s4991_s8 = smov 2  }
  0x8d   : > { %s292_s24 = sld [smem:[%s4356_s23]]   ;;  %s4992_s16 = smov 64  }
  0x8e   : > { %4359 = sst [smem:[#allocation13 + $0x2]] (%p5718_p3), %s4991_s8  ;;  %s4993_s29 = smov 4  }
  0x8f   : > { %4360 = sst [smem:[#allocation13 + $0x3]] (%p5718_p3), %s4992_s16  ;;  %s278_s17 = scalar_lea.sflag [#allocation3], %s277_s9 }
  0x90   : > { %4361 = sst [smem:[#allocation13 + $0x4]] (%p5718_p3), %s4992_s16  ;;  %s4994_s20 = smov [#allocation12]  }
  0x91   : > { %4362 = sst [smem:[#allocation13 + $0x5]] (%p5718_p3), %s4993_s29 }
  0x93   : > { %s3823_s19 = sshll.u32 %s292_s24, 26 }
  0x94   : > { %s3824_s21 = sadd.s32 134217728, %s3823_s19 }
  0x95   : > { %4363 = dma.general (%p5718_p3), %s287_s13, 896, %s301_s14, %s278_s17, %s4994_s20, [#allocation13], %s3824_s21, 0  }
  0x96 PF: > { %p5719_p2 = scmp.ne.s32.totalorder %s5714_s15, 0 }
  0x97   : > { %s5223_s18 = sand.u32 (!%p5719_p2), 1, %s4969_s25   ;;  %p5720_p6 = scmp.ne.s32.totalorder (!%p5719_p2), %s5709_s12, 0 }
  0x98   : > { %325 = sbr.rel (%p5719_p2) target bundleno = 1495 (0x5d7), region = 48  ;;  %s328_s23 = scalar_lea.sflag (!%p5719_p2), [#allocation3], %s5223_s18 }
  0x99   : > { %s4347_s1 = smul.u32 (!%p5719_p2), 56, %s5223_s18 }
  0x9b   : > { %s5227_s30 = scalar_lea.vmem (!%p5719_p2), [#allocation2], %s4347_s1 }
  0x9f   : > { %4948 = dma.done.wait (%p5720_p6), %s328_s23, 896  }
  0xa0   : > { %4950 = vsyncadd (%p5720_p6), %s328_s23, 4294966400  ;;  %p5721_p5 = scmp.eq.s32.totalorder %s5060_s28, 0 }
  0xa2   : > { %4952 = dma.done.wait (%p5721_p5), [#allocation6], 14464   ;;  %p5722_p11 = pmov %p5721_p5 }
  0xa3   : > { %p5723_p12 = pmov %p5721_p5 }
  0xa4   : > { %4954 = vsyncadd (%p5722_p11), [#allocation6], 4294952832 }
  0xa5   : > { %4956 = dma.done.wait (%p5723_p12), [#allocation9], 28672   ;;  %p5724_p13 = pmov %p5721_p5 }
  0xa6   : > { %v5242_v0 = vld [vmem:[%s5227_s30 + $0x8] sm:$0xff]   ;;  %v4453_v1 = vld [vmem:[%s5227_s30 + $0x10] sm:$0xff]   ;;  %s4995_s11 = smov 112   ;;  %v4454_v2 = vld [vmem:[%s5227_s30 + $0x18] sm:$0xff]   ;;  %vm1181_vm0 = vcmask 785408   ;;  %vm442_vm1 = vcmask 916480  }
  0xa7   : > { %4958 = vsyncadd (%p5724_p13), [#allocation9], 4294938624  ;;  %430 = vrot.lane.b32.xlu0 %v5242_v0, %s4995_s11  ;;  %434 = vrot.lane.b32.xlu1 %v4454_v2, %s4995_s11  ;;  %v4455_v3 = vld [vmem:[%s5227_s30 + $0x20] sm:$0xff]   ;;  %v4456_v4 = vld [vmem:[%s5227_s30 + $0x28] sm:$0xff]   ;;  %s3830_s13 = sshll.u32 %s5223_s18, 4  ;;  %s5725_s24 = sld [smem:[#allocation22_spill]] }
  0xa8   : > { %v4457_v5 = vld [vmem:[%s5227_s30 + $0x30] sm:$0xff]   ;;  %v468_v8 = vld [vmem:[#allocation5 + $0x8] sm:$0xff]  ;;  %s377_s10 = scalar_lea.vmem [#allocation11], %s3830_s13  ;;  %s4205_s22 = sshll.u32 %s5060_s28, 8 }
  0xa9   : > { %v467_v6 = vld [vmem:[#allocation5] sm:$0xff]  ;;  %v472_v10 = vld [vmem:[#allocation5 + $0x28] sm:$0xff]  ;;  %s3703_s14 = sshll.u32 %s377_s10, 4  ;;  %s5726_s29 = sld [smem:[#allocation25_spill]]  ;;  %s5634_s14 = int_to_ptr.vmem [resolvable:$true] %s3703_s14 }
  0xaa   : > { %v471_v7 = vld [vmem:[#allocation5 + $0x20] sm:$0xff]  ;;  %v3841_v14 = vcombine.high %v468_v8, %v472_v10  ;;  %v3840_v15 = vcombine.low %v468_v8, %v472_v10  ;;  %v476_v17 = vld [vmem:[#allocation5 + $0x48] sm:$0xff]  ;;  %s3690_s21 = scalar_lea.sflag [#allocation4], %s5223_s18  ;;  %s4903_s17 = scalar_lea.vmem %s5634_s14, 256 }
  0xab   : > { %432 = vrot.lane.b32.xlu0 %v4453_v1, %s4995_s11  ;;  %v3839_v9 = vcombine.high %v467_v6, %v471_v7  ;;  %v3838_v11 = vcombine.low %v467_v6, %v471_v7  ;;  %v475_v12 = vld [vmem:[#allocation5 + $0x40] sm:$0xff]  ;;  %436 = vrot.lane.b32.xlu1 %v4455_v3, %s4995_s11  ;;  %v480_v18 = vld [vmem:[#allocation5 + $0x68] sm:$0xff]  ;;  %p4904_p0 = scmp.ne.s32.totalorder %s5634_s14, %s4903_s17  ;;  %s4996_s28 = smov [#allocation11]  }
  0xac   : > { %v479_v13 = vld [vmem:[#allocation5 + $0x60] sm:$0xff]  ;;  %v3849_v20 = vcombine.high %v476_v17, %v480_v18  ;;  %v484_v22 = vld [vmem:[#allocation5 + $0x88] sm:$0xff]  ;;  %1287 = vmatprep.subr.bf16.mxu1 %v3841_v14  ;;  %v3848_v25 = vcombine.low %v476_v17, %v480_v18  ;;  %s4907_s20 = sshll.u32 %s4996_s28, 4  ;;  %s4908_s20 = int_to_ptr.vmem [resolvable:$false] %s4907_s20 }
  0xad   : > { %v3847_v16 = vcombine.high %v475_v12, %v479_v13  ;;  %v483_v19 = vld [vmem:[#allocation5 + $0x80] sm:$0xff]  ;;  %1194 = vmatprep.subr.bf16.mxu0 %v3839_v9  ;;  %v488_v23 = vld [vmem:[#allocation5 + $0xa8] sm:$0xff]  ;;  %1288 = vmatpush1.bf16.msra.mxu1 %v3840_v15  ;;  %v3846_v24 = vcombine.low %v475_v12, %v479_v13  ;;  %p5727_p7 = scmp.ne.s32.totalorder %s5725_s24, 0  ;;  %s4909_s1 = scalar_lea.vmem %s4908_s20, 512 }
  0xae   : > { %v487_v21 = vld [vmem:[#allocation5 + $0xa0] sm:$0xff]  ;;  %1195 = vmatpush1.bf16.msra.mxu0 %v3838_v11  ;;  %v3857_v27 = vcombine.high %v484_v22, %v488_v23  ;;  %1289 = vmatprep.subr.bf16.mxu1 %v3849_v20  ;;  %v492_v30 = vld [vmem:[#allocation5 + $0xc8] sm:$0xff]  ;;  %v3856_v33 = vcombine.low %v484_v22, %v488_v23  ;;  %p4910_p10 = scmp.lt.s32.totalorder %s5634_s14, %s4908_s20  ;;  %p4911_p1 = scmp.lt.s32.totalorder %s4909_s1, %s4903_s17 }
  0xaf   : > { %438 = vrot.lane.b32.xlu0 %v4456_v4, %s4995_s11  ;;  %440 = vrot.lane.b32.xlu1 %v4457_v5, %s4995_s11  ;;  %v3855_v26 = vcombine.high %v483_v19, %v487_v21  ;;  %v491_v28 = vld [vmem:[#allocation5 + $0xc0] sm:$0xff]  ;;  %v496_v31 = vld [vmem:[#allocation5 + $0xe8] sm:$0xff]  ;;  %v3854_v32 = vcombine.low %v483_v19, %v487_v21  ;;  %s5639_s19 = scalar_lea.hbm %s5726_s29, %s4205_s22  ;;  %p4905_p8 = pnand %p4904_p0, %p5727_p7 }
  0xb0   : > { %1196 = vmatprep.subr.bf16.mxu0 %v3847_v16  ;;  %v495_v29 = vld [vmem:[#allocation5 + $0xe0] sm:$0xff]  ;;  %v3865_v35 = vcombine.high %v492_v30, %v496_v31  ;;  %v500_v38 = vld [vmem:[#allocation5 + $0x108] sm:$0xff]  ;;  %v3864_v41 = vcombine.low %v492_v30, %v496_v31  ;;  %p4912_p3 = por %p4911_p1, %p4910_p10 }
  0xb1   : > { %1290 = vmatpush1.bf16.msra.mxu1 %v3848_v25  ;;  %v3863_v34 = vcombine.high %v491_v28, %v495_v29  ;;  %v499_v36 = vld [vmem:[#allocation5 + $0x100] sm:$0xff]  ;;  %v504_v39 = vld [vmem:[#allocation5 + $0x128] sm:$0xff]  ;;  %v3862_v40 = vcombine.low %v491_v28, %v495_v29  ;;  %p4906_p9 = pneg %p4905_p8 }
  0xb2   : > { %1197 = vmatpush1.bf16.msra.mxu0 %v3846_v24  ;;  %1291 = vmatprep.subr.bf16.mxu1 %v3857_v27  ;;  %v503_v37 = vld [vmem:[#allocation5 + $0x120] sm:$0xff]  ;;  %v3873_v43 = vcombine.high %v500_v38, %v504_v39  ;;  %v508_v46 = vld [vmem:[#allocation5 + $0x148] sm:$0xff]  ;;  %v3872_v49 = vcombine.low %v500_v38, %v504_v39 }
  0xb3   : > { %1198 = vmatprep.subr.bf16.mxu0 %v3855_v26  ;;  %v3871_v42 = vcombine.high %v499_v36, %v503_v37  ;;  %v507_v44 = vld [vmem:[#allocation5 + $0x140] sm:$0xff]  ;;  %v512_v47 = vld [vmem:[#allocation5 + $0x168] sm:$0xff]  ;;  %v3870_v48 = vcombine.low %v499_v36, %v503_v37  ;;  %p4913_p2 = pnand %p4912_p3, %p4906_p9 }
  0xb4   : > { %v511_v45 = vld [vmem:[#allocation5 + $0x160] sm:$0xff]  ;;  %v3881_v51 = vcombine.high %v508_v46, %v512_v47  ;;  %v516_v54 = vld [vmem:[#allocation5 + $0x188] sm:$0xff]  ;;  %v3880_v57 = vcombine.low %v508_v46, %v512_v47 }
  0xb5   : > { %1292 = vmatpush1.bf16.msra.mxu1 %v3856_v33  ;;  %v3879_v50 = vcombine.high %v507_v44, %v511_v45  ;;  %v515_v52 = vld [vmem:[#allocation5 + $0x180] sm:$0xff]  ;;  %v520_v55 = vld [vmem:[#allocation5 + $0x1a8] sm:$0xff]  ;;  %v3878_v56 = vcombine.low %v507_v44, %v511_v45 }
  0xb6   : > { %1199 = vmatpush1.bf16.msra.mxu0 %v3854_v32  ;;  %1293 = vmatprep.subr.bf16.mxu1 %v3865_v35  ;;  %v519_v53 = vld [vmem:[#allocation5 + $0x1a0] sm:$0xff]  ;;  %v3889_v59 = vcombine.high %v516_v54, %v520_v55  ;;  %v524_v62 = vld [vmem:[#allocation5 + $0x1c8] sm:$0xff]  ;;  %v3888_v2 = vcombine.low %v516_v54, %v520_v55  ;;  %v474_v54 = vld [vmem:[#allocation5 + $0x38] sm:$0xff] }
  0xb7   : > { %1200 = vmatprep.subr.bf16.mxu0 %v3863_v34  ;;  %v3887_v58 = vcombine.high %v515_v52, %v519_v53  ;;  %v523_v60 = vld [vmem:[#allocation5 + $0x1c0] sm:$0xff]  ;;  %v528_v63 = vld [vmem:[#allocation5 + $0x1e8] sm:$0xff]  ;;  %v3886_v1 = vcombine.low %v515_v52, %v519_v53  ;;  %v473_v52 = vld [vmem:[#allocation5 + $0x30] sm:$0xff] }
  0xb8   : > { %v527_v61 = vld [vmem:[#allocation5 + $0x1e0] sm:$0xff]  ;;  %v3897_v4 = vcombine.high %v524_v62, %v528_v63  ;;  %v532_v7 = vld [vmem:[#allocation5 + $0x208] sm:$0xff]  ;;  %v3896_v10 = vcombine.low %v524_v62, %v528_v63  ;;  %v470_v53 = vld [vmem:[#allocation5 + $0x18] sm:$0xff] }
  0xb9   : > { %1294 = vmatpush1.bf16.msra.mxu1 %v3864_v41  ;;  %v3895_v3 = vcombine.high %v523_v60, %v527_v61  ;;  %v531_v5 = vld [vmem:[#allocation5 + $0x200] sm:$0xff]  ;;  %v536_v8 = vld [vmem:[#allocation5 + $0x228] sm:$0xff]  ;;  %v3894_v9 = vcombine.low %v523_v60, %v527_v61  ;;  %v3845_v60 = vcombine.high %v470_v53, %v474_v54  ;;  %v477_v62 = vld [vmem:[#allocation5 + $0x50] sm:$0xff] }
  0xba   : > { %1201 = vmatpush1.bf16.msra.mxu0 %v3862_v40  ;;  %1295 = vmatprep.subr.bf16.mxu1 %v3873_v43  ;;  %v535_v6 = vld [vmem:[#allocation5 + $0x220] sm:$0xff]  ;;  %v3905_v12 = vcombine.high %v532_v7, %v536_v8  ;;  %v540_v15 = vld [vmem:[#allocation5 + $0x248] sm:$0xff]  ;;  %v3904_v18 = vcombine.low %v532_v7, %v536_v8  ;;  %v481_v63 = vld [vmem:[#allocation5 + $0x70] sm:$0xff] }
  0xbb   : > { %1202 = vmatprep.subr.bf16.mxu0 %v3871_v42  ;;  %v3903_v11 = vcombine.high %v531_v5, %v535_v6  ;;  %v539_v13 = vld [vmem:[#allocation5 + $0x240] sm:$0xff]  ;;  %v544_v16 = vld [vmem:[#allocation5 + $0x268] sm:$0xff]  ;;  %v3902_v17 = vcombine.low %v531_v5, %v535_v6  ;;  %v485_v5 = vld [vmem:[#allocation5 + $0x90] sm:$0xff] }
  0xbc   : > { %v543_v14 = vld [vmem:[#allocation5 + $0x260] sm:$0xff]  ;;  %v3913_v20 = vcombine.high %v540_v15, %v544_v16  ;;  %v548_v23 = vld [vmem:[#allocation5 + $0x288] sm:$0xff]  ;;  %v3912_v26 = vcombine.low %v540_v15, %v544_v16  ;;  %v489_v6 = vld [vmem:[#allocation5 + $0xb0] sm:$0xff] }
  0xbd   : > { %1296 = vmatpush1.bf16.msra.mxu1 %v3872_v49  ;;  %v3911_v19 = vcombine.high %v539_v13, %v543_v14  ;;  %v547_v21 = vld [vmem:[#allocation5 + $0x280] sm:$0xff]  ;;  %v552_v24 = vld [vmem:[#allocation5 + $0x2a8] sm:$0xff]  ;;  %v3910_v25 = vcombine.low %v539_v13, %v543_v14  ;;  %v486_v7 = vld [vmem:[#allocation5 + $0x98] sm:$0xff]  ;;  %v3850_v13 = vcombine.low %v477_v62, %v481_v63 }
  0xbe   : > { %1203 = vmatpush1.bf16.msra.mxu0 %v3870_v48  ;;  %1297 = vmatprep.subr.bf16.mxu1 %v3881_v51  ;;  %v551_v22 = vld [vmem:[#allocation5 + $0x2a0] sm:$0xff]  ;;  %v556_v29 = vld [vmem:[#allocation5 + $0x2c8] sm:$0xff]  ;;  %v3921_v31 = vcombine.high %v548_v23, %v552_v24  ;;  %v3920_v34 = vcombine.low %v548_v23, %v552_v24  ;;  %v469_v51 = vld [vmem:[#allocation5 + $0x10] sm:$0xff] }
  0xbf   : > { %1204 = vmatprep.subr.bf16.mxu0 %v3879_v50  ;;  %v555_v27 = vld [vmem:[#allocation5 + $0x2c0] sm:$0xff]  ;;  %v3919_v30 = vcombine.high %v547_v21, %v551_v22  ;;  %v560_v32 = vld [vmem:[#allocation5 + $0x2e8] sm:$0xff]  ;;  %v3918_v33 = vcombine.low %v547_v21, %v551_v22  ;;  %v490_v8 = vld [vmem:[#allocation5 + $0xb8] sm:$0xff]  ;;  %v3858_v22 = vcombine.low %v485_v5, %v489_v6 }
  0xc0   : > { %v559_v28 = vld [vmem:[#allocation5 + $0x2e0] sm:$0xff]  ;;  %v564_v37 = vld [vmem:[#allocation5 + $0x308] sm:$0xff]  ;;  %v3929_v40 = vcombine.high %v556_v29, %v560_v32  ;;  %v3928_v42 = vcombine.low %v556_v29, %v560_v32  ;;  %v493_v15 = vld [vmem:[#allocation5 + $0xd0] sm:$0xff]  ;;  %v3861_v21 = vcombine.high %v486_v7, %v490_v8  ;;  %v3860_v23 = vcombine.low %v486_v7, %v490_v8 }
  0xc1   : > { %1298 = vmatpush1.bf16.msra.mxu1 %v3880_v57  ;;  %v563_v35 = vld [vmem:[#allocation5 + $0x300] sm:$0xff]  ;;  %v568_v38 = vld [vmem:[#allocation5 + $0x328] sm:$0xff]  ;;  %v3927_v39 = vcombine.high %v555_v27, %v559_v28  ;;  %v3926_v41 = vcombine.low %v555_v27, %v559_v28  ;;  %v497_v16 = vld [vmem:[#allocation5 + $0xf0] sm:$0xff] }
  0xc2   : > { %1205 = vmatpush1.bf16.msra.mxu0 %v3878_v56  ;;  %1299 = vmatprep.subr.bf16.mxu1 %v3889_v59  ;;  %v567_v36 = vld [vmem:[#allocation5 + $0x320] sm:$0xff]  ;;  %v572_v45 = vld [vmem:[#allocation5 + $0x348] sm:$0xff]  ;;  %v3937_v48 = vcombine.high %v564_v37, %v568_v38  ;;  %v3936_v50 = vcombine.low %v564_v37, %v568_v38  ;;  %v3843_v59 = vcombine.high %v469_v51, %v473_v52  ;;  %v502_v27 = vld [vmem:[#allocation5 + $0x118] sm:$0xff] }
  0xc3   : > { %1206 = vmatprep.subr.bf16.mxu0 %v3887_v58  ;;  %v571_v43 = vld [vmem:[#allocation5 + $0x340] sm:$0xff]  ;;  %v576_v46 = vld [vmem:[#allocation5 + $0x368] sm:$0xff]  ;;  %v3935_v47 = vcombine.high %v563_v35, %v567_v36  ;;  %v3934_v49 = vcombine.low %v563_v35, %v567_v36  ;;  %v506_v28 = vld [vmem:[#allocation5 + $0x138] sm:$0xff]  ;;  %v3867_v29 = vcombine.high %v493_v15, %v497_v16  ;;  %v3866_v32 = vcombine.low %v493_v15, %v497_v16 }
  0xc4   : > { %v575_v44 = vld [vmem:[#allocation5 + $0x360] sm:$0xff]  ;;  %v3945_v56 = vcombine.high %v572_v45, %v576_v46  ;;  %v3944_v58 = vcombine.low %v572_v45, %v576_v46  ;;  %v4458_v61 = vld [vmem:[%s5227_s30] sm:$0xff]   ;;  %v510_v35 = vld [vmem:[#allocation5 + $0x158] sm:$0xff]  ;;  %v3877_v38 = vcombine.high %v502_v27, %v506_v28 }
  0xc5   : > { %1300 = vmatpush1.bf16.msra.mxu1 %v3888_v2  ;;  %v3943_v55 = vcombine.high %v571_v43, %v575_v44  ;;  %v3942_v57 = vcombine.low %v571_v43, %v575_v44  ;;  %v482_v2 = vld [vmem:[#allocation5 + $0x78] sm:$0xff]  ;;  %v517_v45 = vld [vmem:[#allocation5 + $0x190] sm:$0xff] }
  0xc6   : > { %1207 = vmatpush1.bf16.msra.mxu0 %v3886_v1  ;;  %1301 = vmatprep.subr.bf16.mxu1 %v3897_v4  ;;  %v478_v1 = vld [vmem:[#allocation5 + $0x58] sm:$0xff]  ;;  %v3844_v4 = vcombine.low %v470_v53, %v474_v54  ;;  %v521_v46 = vld [vmem:[#allocation5 + $0x1b0] sm:$0xff] }
  0xc7   : > { %1208 = vmatprep.subr.bf16.mxu0 %v3895_v3  ;;  %v3842_v3 = vcombine.low %v469_v51, %v473_v52  ;;  %v3852_v14 = vcombine.low %v478_v1, %v482_v2  ;;  %v514_v36 = vld [vmem:[#allocation5 + $0x178] sm:$0xff]  ;;  %v3891_v52 = vcombine.high %v517_v45, %v521_v46  ;;  %v525_v54 = vld [vmem:[#allocation5 + $0x1d0] sm:$0xff] }
  0xc8   : > { %v3885_v44 = vcombine.high %v510_v35, %v514_v36  ;;  %v3884_v51 = vcombine.low %v510_v35, %v514_v36  ;;  %v546_v15 = vld [vmem:[#allocation5 + $0x278] sm:$0xff] }
  0xc9   : > { %1302 = vmatpush1.bf16.msra.mxu1 %v3896_v10  ;;  %v3851_v10 = vcombine.high %v477_v62, %v481_v63  ;;  %v558_v35 = vld [vmem:[#allocation5 + $0x2d8] sm:$0xff] }
  0xca   : > { %1209 = vmatpush1.bf16.msra.mxu0 %v3894_v9  ;;  %1303 = vmatprep.subr.bf16.mxu1 %v3905_v12  ;;  %v562_v36 = vld [vmem:[#allocation5 + $0x2f8] sm:$0xff] }
  0xcb   : > { %1210 = vmatprep.subr.bf16.mxu0 %v3903_v11  ;;  %v3853_v11 = vcombine.high %v478_v1, %v482_v2  ;;  %v533_v1 = vld [vmem:[#allocation5 + $0x210] sm:$0xff] }
  0xcc   : > { %v537_v2 = vld [vmem:[#allocation5 + $0x230] sm:$0xff] }
  0xcd   : > { %1304 = vmatpush1.bf16.msra.mxu1 %v3904_v18  ;;  %v498_v18 = vld [vmem:[#allocation5 + $0xf8] sm:$0xff]  ;;  %v3907_v8 = vcombine.high %v533_v1, %v537_v2  ;;  %v3906_v16 = vcombine.low %v533_v1, %v537_v2  ;;  %v4476_v2 = vld [vmem:[#allocation8 + $0x4c] ss:$16 sps:$4 sm:$0xff]  }
  0xce   : > { %1211 = vmatpush1.bf16.msra.mxu0 %v3902_v17  ;;  %1305 = vmatprep.subr.bf16.mxu1 %v3913_v20  ;;  %v494_v17 = vld [vmem:[#allocation5 + $0xd8] sm:$0xff]  ;;  %v3859_v20 = vcombine.high %v485_v5, %v489_v6 }
  0xcf   : > { %1212 = vmatprep.subr.bf16.mxu0 %v3911_v19  ;;  %v4473_v1 = vld [vmem:[#allocation8 + $0x44] ss:$16 sps:$4 sm:$0xff]  }
  0xd1   : > { %1306 = vmatpush1.bf16.msra.mxu1 %v3912_v26  ;;  %v505_v26 = vld [vmem:[#allocation5 + $0x130] sm:$0xff] }
  0xd2   : > { %1213 = vmatpush1.bf16.msra.mxu0 %v3910_v25  ;;  %1307 = vmatprep.subr.bf16.mxu1 %v3921_v31  ;;  %v501_v25 = vld [vmem:[#allocation5 + $0x110] sm:$0xff] }
  0xd3   : > { %1214 = vmatprep.subr.bf16.mxu0 %v3919_v30  ;;  %v3869_v30 = vcombine.high %v494_v17, %v498_v18  ;;  %v3875_v37 = vcombine.high %v501_v25, %v505_v26 }
  0xd5   : > { %1308 = vmatpush1.bf16.msra.mxu1 %v3920_v34  ;;  %v513_v34 = vld [vmem:[#allocation5 + $0x170] sm:$0xff] }
  0xd6   : > { %1215 = vmatpush1.bf16.msra.mxu0 %v3918_v33  ;;  %1309 = vmatprep.subr.bf16.mxu1 %v3929_v40  ;;  %v509_v33 = vld [vmem:[#allocation5 + $0x150] sm:$0xff]  ;;  %v3876_v40 = vcombine.low %v502_v27, %v506_v28  ;;  %v554_v27 = vld [vmem:[#allocation5 + $0x2b8] sm:$0xff] }
  0xd7   : > { %1216 = vmatprep.subr.bf16.mxu0 %v3927_v39  ;;  %v3874_v39 = vcombine.low %v501_v25, %v505_v26  ;;  %v3883_v43 = vcombine.high %v509_v33, %v513_v34  ;;  %v553_v25 = vld [vmem:[#allocation5 + $0x2b0] sm:$0xff]  ;;  %v550_v26 = vld [vmem:[#allocation5 + $0x298] sm:$0xff] }
  0xd9   : > { %1310 = vmatpush1.bf16.msra.mxu1 %v3928_v42 }
  0xda   : > { %1217 = vmatpush1.bf16.msra.mxu0 %v3926_v41  ;;  %1311 = vmatprep.subr.bf16.mxu1 %v3937_v48  ;;  %v4787_v41 = vld [vmem:[%s5227_s30 + $0x10] sm:$0xff]  }
  0xdb   : > { %1218 = vmatprep.subr.bf16.mxu0 %v3935_v47  ;;  %v518_v47 = vld [vmem:[#allocation5 + $0x198] sm:$0xff] }
  0xdc   : > { %v522_v48 = vld [vmem:[#allocation5 + $0x1b8] sm:$0xff] }
  0xdd   : > { %1312 = vmatpush1.bf16.msra.mxu1 %v3936_v50  ;;  %v3882_v50 = vcombine.low %v509_v33, %v513_v34  ;;  %v3893_v53 = vcombine.high %v518_v47, %v522_v48  ;;  %v557_v33 = vld [vmem:[#allocation5 + $0x2d0] sm:$0xff] }
  0xde   : > { %1219 = vmatpush1.bf16.msra.mxu0 %v3934_v49  ;;  %1313 = vmatprep.subr.bf16.mxu1 %v3945_v56  ;;  %v526_v56 = vld [vmem:[#allocation5 + $0x1d8] sm:$0xff]  ;;  %v561_v34 = vld [vmem:[#allocation5 + $0x2f0] sm:$0xff] }
  0xdf   : > { %1220 = vmatprep.subr.bf16.mxu0 %v3943_v55  ;;  %v529_v55 = vld [vmem:[#allocation5 + $0x1f0] sm:$0xff] }
  0xe0   : > { %v3899_v62 = vcombine.high %v525_v54, %v529_v55  ;;  %v3898_v6 = vcombine.low %v525_v54, %v529_v55  ;;  %v577_v54 = vld [vmem:[#allocation5 + $0x370] sm:$0xff]  ;;  %v574_v55 = vld [vmem:[#allocation5 + $0x358] sm:$0xff] }
  0xe1   : > { %1314 = vmatpush1.bf16.msra.mxu1 %v3944_v58  ;;  %v3890_v58 = vcombine.low %v517_v45, %v521_v46  ;;  %v569_v45 = vld [vmem:[#allocation5 + $0x330] sm:$0xff]  ;;  %v566_v46 = vld [vmem:[#allocation5 + $0x318] sm:$0xff] }
  0xe2   : > { %1221 = vmatpush1.bf16.msra.mxu0 %v3942_v57  ;;  %1473 = vmatprep.subr.bf16.mxu1 %v3845_v60  ;;  %v530_v57 = vld [vmem:[#allocation5 + $0x1f8] sm:$0xff]  ;;  %v4788_v60 = vld [vmem:[%s5227_s30 + $0x18] sm:$0xff]  }
  0xe3   : > { %1380 = vmatprep.subr.bf16.mxu0 %v3843_v59  ;;  %v3892_v59 = vcombine.low %v518_v47, %v522_v48  ;;  %v3901_v63 = vcombine.high %v526_v56, %v530_v57  ;;  %v3900_v7 = vcombine.low %v526_v56, %v530_v57  ;;  %v570_v47 = vld [vmem:[#allocation5 + $0x338] sm:$0xff]  ;;  %v3930_v48 = vcombine.low %v557_v33, %v561_v34 }
  0xe4   : > { %v578_v56 = vld [vmem:[#allocation5 + $0x378] sm:$0xff] }
 0x119   : > { %v5257_v9 = vpop.permute.xlu0 %430  ;;  %v5282_v31 = vpop.permute.xlu1 %434 }
 0x11a   : > { %3950 = vmatprep.mubr.msk.bf16.mxu0 %vm1181_vm0, %v5257_v9  ;;  %3956 = vmatprep.mubr.msk.bf16.mxu1 %vm1181_vm0, %v5257_v9  ;;  %v5265_v12 = vsel %vm442_vm1, %v4458_v61, %v5257_v9  ;;  %v5291_v42 = vsel %vm442_vm1, %v4787_v41, %v5282_v31  ;;  %v565_v41 = vld [vmem:[#allocation5 + $0x310] sm:$0xff] }
 0x11b   : > { %1227 = vmatmul.mubr.bf16.vlgmr.msra.gmra.mrb[0].mxu0 %v5265_v12  ;;  %1320 = vmatmul.mubr.bf16.vlgmr.msra.gmra.mrb[0].mxu1 %v5265_v12  ;;  %v3938_v57 = vcombine.low %v565_v41, %v569_v45 }
 0x11c   : > { %1381 = vmatpush1.bf16.msra.mxu0 %v3842_v3  ;;  %1474 = vmatpush1.bf16.msra.mxu1 %v3844_v4  ;;  %v534_v3 = vld [vmem:[#allocation5 + $0x218] sm:$0xff] }
 0x11d   : > { %1382 = vmatprep.subr.bf16.mxu0 %v3851_v10  ;;  %1475 = vmatprep.subr.bf16.mxu1 %v3853_v11  ;;  %v5269_v19 = vpop.permute.xlu0 %432  ;;  %v5295_v49 = vpop.permute.xlu1 %436  ;;  %v538_v4 = vld [vmem:[#allocation5 + $0x238] sm:$0xff]  ;;  %v541_v11 = vld [vmem:[#allocation5 + $0x250] sm:$0xff] }
 0x11e   : > { %3951 = vmatprep.mubr.msk.bf16.mxu0 %vm1181_vm0, %v5269_v19  ;;  %3957 = vmatprep.mubr.msk.bf16.mxu1 %vm1181_vm0, %v5269_v19  ;;  %v5278_v24 = vsel %vm442_vm1, %v5242_v0, %v5269_v19  ;;  %v3868_v0 = vcombine.low %v494_v17, %v498_v18  ;;  %v5304_v61 = vsel %vm442_vm1, %v4788_v60, %v5295_v49  ;;  %v4789_v18 = vld [vmem:[%s5227_s30 + $0x20] sm:$0xff]  }
 0x11f   : > { %v3909_v10 = vcombine.high %v534_v3, %v538_v4  ;;  %v3908_v17 = vcombine.low %v534_v3, %v538_v4  ;;  %v3949_v60 = vcombine.high %v574_v55, %v578_v56  ;;  %v4471_v3 = vld [vmem:[#allocation8 + $0x40] ss:$16 sps:$4 sm:$0xff]   ;;  %v4474_v4 = vld [vmem:[#allocation8 + $0x48] ss:$16 sps:$4 sm:$0xff]  }
 0x120   : > { %1383 = vmatpush1.bf16.msra.mxu0 %v3850_v13  ;;  %1476 = vmatpush1.bf16.msra.mxu1 %v3852_v14  ;;  %v545_v13 = vld [vmem:[#allocation5 + $0x270] sm:$0xff]  ;;  %v542_v14 = vld [vmem:[#allocation5 + $0x258] sm:$0xff] }
 0x121   : > { %1384 = vmatprep.subr.bf16.mxu0 %v3859_v20  ;;  %1477 = vmatprep.subr.bf16.mxu1 %v3861_v21  ;;  %v5308_v5 = vpop.permute.xlu0 %438  ;;  %v3915_v21 = vcombine.high %v541_v11, %v545_v13  ;;  %v5321_v28 = vpop.permute.xlu1 %440 }
 0x122   : > { %v5317_v20 = vsel %vm442_vm1, %v4789_v18, %v5308_v5  ;;  %v4492_v18 = vld [vmem:[#allocation8 + $0xa8] ss:$16 sps:$4 sm:$0xff]  }
 0x123   : > { %1237 = vmatmul.mubr.bf16.gmra.mrb[4].mxu0 %v5278_v24  ;;  %1330 = vmatmul.mubr.bf16.gmra.mrb[4].mxu1 %v5278_v24 }
 0x124   : > { %1385 = vmatpush1.bf16.msra.mxu0 %v3858_v22  ;;  %1478 = vmatpush1.bf16.msra.mxu1 %v3860_v23  ;;  %v3917_v22 = vcombine.high %v542_v14, %v546_v15  ;;  %v549_v23 = vld [vmem:[#allocation5 + $0x290] sm:$0xff] }
 0x125   : > { %1386 = vmatprep.subr.bf16.mxu0 %v3867_v29  ;;  %1479 = vmatprep.subr.bf16.mxu1 %v3869_v30  ;;  %v3914_v29 = vcombine.low %v541_v11, %v545_v13  ;;  %v3916_v30 = vcombine.low %v542_v14, %v546_v15  ;;  %v4488_v11 = vld [vmem:[#allocation8 + $0x8c] ss:$16 sps:$4 sm:$0xff]   ;;  %v4483_v13 = vld [vmem:[#allocation8 + $0x80] ss:$16 sps:$4 sm:$0xff]   ;;  %v4486_v14 = vld [vmem:[#allocation8 + $0x88] ss:$16 sps:$4 sm:$0xff]  }
 0x126   : > { %3952 = vmatprep.mubr.msk.bf16.mxu0 %vm1181_vm0, %v5282_v31  ;;  %3958 = vmatprep.mubr.msk.bf16.mxu1 %vm1181_vm0, %v5282_v31  ;;  %v4491_v15 = vld [vmem:[#allocation8 + $0xa4] ss:$16 sps:$4 sm:$0xff]  }
 0x128   : > { %1387 = vmatpush1.bf16.msra.mxu0 %v3866_v32  ;;  %1480 = vmatpush1.bf16.msra.mxu1 %v3868_v0  ;;  %v3923_v32 = vcombine.high %v549_v23, %v553_v25  ;;  %v3925_v0 = vcombine.high %v550_v26, %v554_v27 }
 0x129   : > { %1388 = vmatprep.subr.bf16.mxu0 %v3875_v37  ;;  %1481 = vmatprep.subr.bf16.mxu1 %v3877_v38  ;;  %v3922_v37 = vcombine.low %v549_v23, %v553_v25  ;;  %v3924_v38 = vcombine.low %v550_v26, %v554_v27  ;;  %v4498_v23 = vld [vmem:[#allocation8 + $0xc8] ss:$16 sps:$4 sm:$0xff]   ;;  %v4503_v25 = vld [vmem:[#allocation8 + $0xe4] ss:$16 sps:$4 sm:$0xff]   ;;  %v4506_v26 = vld [vmem:[#allocation8 + $0xec] ss:$16 sps:$4 sm:$0xff]  }
 0x12a   : > { %v4501_v27 = vld [vmem:[#allocation8 + $0xe0] ss:$16 sps:$4 sm:$0xff]  }
 0x12b   : > { %1247 = vmatmul.mubr.bf16.gmra.mrb[8].mxu0 %v5291_v42  ;;  %1340 = vmatmul.mubr.bf16.gmra.mrb[8].mxu1 %v5291_v42 }
 0x12c   : > { %1389 = vmatpush1.bf16.msra.mxu0 %v3874_v39  ;;  %1482 = vmatpush1.bf16.msra.mxu1 %v3876_v40  ;;  %v4790_v39 = vld [vmem:[%s5227_s30 + $0x28] sm:$0xff]  }
 0x12d   : > { %1390 = vmatprep.subr.bf16.mxu0 %v3883_v43  ;;  %1483 = vmatprep.subr.bf16.mxu1 %v3885_v44  ;;  %v5330_v40 = vsel %vm442_vm1, %v4790_v39, %v5321_v28  ;;  %v3931_v43 = vcombine.high %v557_v33, %v561_v34  ;;  %v3933_v44 = vcombine.high %v558_v35, %v562_v36  ;;  %v4515_v33 = vld [vmem:[#allocation8 + $0x124] ss:$16 sps:$4 sm:$0xff]   ;;  %v4518_v34 = vld [vmem:[#allocation8 + $0x12c] ss:$16 sps:$4 sm:$0xff]   ;;  %v4519_v39 = vld [vmem:[#allocation8 + $0x140] ss:$16 sps:$4 sm:$0xff]  }
 0x12e   : > { %3953 = vmatprep.mubr.msk.bf16.mxu0 %vm1181_vm0, %v5295_v49  ;;  %3959 = vmatprep.mubr.msk.bf16.mxu1 %vm1181_vm0, %v5295_v49 }
 0x130   : > { %1391 = vmatpush1.bf16.msra.mxu0 %v3882_v50  ;;  %1484 = vmatpush1.bf16.msra.mxu1 %v3884_v51  ;;  %v3932_v50 = vcombine.low %v558_v35, %v562_v36  ;;  %v3939_v51 = vcombine.high %v565_v41, %v569_v45  ;;  %v4513_v35 = vld [vmem:[#allocation8 + $0x120] ss:$16 sps:$4 sm:$0xff]   ;;  %v4516_v36 = vld [vmem:[#allocation8 + $0x128] ss:$16 sps:$4 sm:$0xff]   ;;  %v4527_v41 = vld [vmem:[#allocation8 + $0x164] ss:$16 sps:$4 sm:$0xff]  }
 0x131   : > { %1392 = vmatprep.subr.bf16.mxu0 %v3891_v52  ;;  %1485 = vmatprep.subr.bf16.mxu1 %v3893_v53  ;;  %v3941_v52 = vcombine.high %v566_v46, %v570_v47  ;;  %v573_v53 = vld [vmem:[#allocation5 + $0x350] sm:$0xff] }
 0x132   : > { %v4528_v45 = vld [vmem:[#allocation8 + $0x168] ss:$16 sps:$4 sm:$0xff]  }
 0x133   : > { %1257 = vmatmul.mubr.bf16.gmra.mrb[12].mxu0 %v5304_v61  ;;  %1350 = vmatmul.mubr.bf16.gmra.mrb[12].mxu1 %v5304_v61 }
 0x134   : > { %1393 = vmatpush1.bf16.msra.mxu0 %v3890_v58  ;;  %1486 = vmatpush1.bf16.msra.mxu1 %v3892_v59  ;;  %v3940_v58 = vcombine.low %v566_v46, %v570_v47  ;;  %v3947_v59 = vcombine.high %v573_v53, %v577_v54  ;;  %v4533_v46 = vld [vmem:[#allocation8 + $0x184] ss:$16 sps:$4 sm:$0xff]   ;;  %v4536_v47 = vld [vmem:[#allocation8 + $0x18c] ss:$16 sps:$4 sm:$0xff]  }
 0x135   : > { %1394 = vmatprep.subr.bf16.mxu0 %v3899_v62  ;;  %1487 = vmatprep.subr.bf16.mxu1 %v3901_v63  ;;  %v3946_v62 = vcombine.low %v573_v53, %v577_v54  ;;  %v4468_v63 = vld [vmem:[#allocation8 + $0x28] ss:$16 sps:$4 sm:$0xff]   ;;  %v4537_v53 = vld [vmem:[#allocation8 + $0x1a0] ss:$16 sps:$4 sm:$0xff]  }
 0x136   : > { %3954 = vmatprep.mubr.msk.bf16.mxu0 %vm1181_vm0, %v5308_v5  ;;  %3960 = vmatprep.mubr.msk.bf16.mxu1 %vm1181_vm0, %v5308_v5  ;;  %v4540_v54 = vld [vmem:[#allocation8 + $0x1a8] ss:$16 sps:$4 sm:$0xff]  }
 0x138   : > { %1395 = vmatpush1.bf16.msra.mxu0 %v3898_v6  ;;  %1488 = vmatpush1.bf16.msra.mxu1 %v3900_v7  ;;  %v4482_v6 = vld [vmem:[#allocation8 + $0x6c] ss:$16 sps:$4 sm:$0xff]   ;;  %v4477_v7 = vld [vmem:[#allocation8 + $0x60] ss:$16 sps:$4 sm:$0xff]  }
 0x139   : > { %1396 = vmatprep.subr.bf16.mxu0 %v3907_v8  ;;  %1489 = vmatprep.subr.bf16.mxu1 %v3909_v10  ;;  %v4480_v8 = vld [vmem:[#allocation8 + $0x68] ss:$16 sps:$4 sm:$0xff]   ;;  %v4485_v10 = vld [vmem:[#allocation8 + $0x84] ss:$16 sps:$4 sm:$0xff]  }
 0x13b   : > { %1267 = vmatmul.mubr.bf16.gmra.mrb[16].mxu0 %v5317_v20  ;;  %1360 = vmatmul.mubr.bf16.gmra.mrb[16].mxu1 %v5317_v20 }
 0x13c   : > { %1397 = vmatpush1.bf16.msra.mxu0 %v3906_v16  ;;  %1490 = vmatpush1.bf16.msra.mxu1 %v3908_v17  ;;  %v4494_v16 = vld [vmem:[#allocation8 + $0xac] ss:$16 sps:$4 sm:$0xff]   ;;  %v4489_v17 = vld [vmem:[#allocation8 + $0xa0] ss:$16 sps:$4 sm:$0xff]  }
 0x13d   : > { %1398 = vmatprep.subr.bf16.mxu0 %v3915_v21  ;;  %1491 = vmatprep.subr.bf16.mxu1 %v3917_v22  ;;  %v4500_v21 = vld [vmem:[#allocation8 + $0xcc] ss:$16 sps:$4 sm:$0xff]   ;;  %v4495_v22 = vld [vmem:[#allocation8 + $0xc0] ss:$16 sps:$4 sm:$0xff]  }
 0x13e   : > { %3955 = vmatprep.mubr.msk.bf16.mxu0 %vm1181_vm0, %v5321_v28  ;;  %3961 = vmatprep.mubr.msk.bf16.mxu1 %vm1181_vm0, %v5321_v28 }
 0x140   : > { %1399 = vmatpush1.bf16.msra.mxu0 %v3914_v29  ;;  %1492 = vmatpush1.bf16.msra.mxu1 %v3916_v30  ;;  %v4509_v29 = vld [vmem:[#allocation8 + $0x104] ss:$16 sps:$4 sm:$0xff]   ;;  %v4512_v30 = vld [vmem:[#allocation8 + $0x10c] ss:$16 sps:$4 sm:$0xff]  }
 0x141   : > { %1400 = vmatprep.subr.bf16.mxu0 %v3923_v32  ;;  %1493 = vmatprep.subr.bf16.mxu1 %v3925_v0  ;;  %v4507_v32 = vld [vmem:[#allocation8 + $0x100] ss:$16 sps:$4 sm:$0xff]   ;;  %v4510_v0 = vld [vmem:[#allocation8 + $0x108] ss:$16 sps:$4 sm:$0xff]  }
 0x143   : > { %1277 = vmatmul.mubr.bf16.gmra.mrb[20].mxu0 %v5330_v40  ;;  %1370 = vmatmul.mubr.bf16.gmra.mrb[20].mxu1 %v5330_v40 }
 0x144   : > { %1401 = vmatpush1.bf16.msra.mxu0 %v3922_v37  ;;  %1494 = vmatpush1.bf16.msra.mxu1 %v3924_v38  ;;  %v4521_v37 = vld [vmem:[#allocation8 + $0x144] ss:$16 sps:$4 sm:$0xff]   ;;  %v4524_v38 = vld [vmem:[#allocation8 + $0x14c] ss:$16 sps:$4 sm:$0xff]  }
 0x145   : > { %3962 = vmatprep.mubr.msk.bf16.mxu0 %vm1181_vm0, %v5257_v9  ;;  %3968 = vmatprep.mubr.msk.bf16.mxu1 %vm1181_vm0, %v5257_v9  ;;  %v3948_v9 = vcombine.low %v574_v55, %v578_v56  ;;  %v4545_v55 = vld [vmem:[#allocation8 + $0x1c4] ss:$16 sps:$4 sm:$0xff]   ;;  %v4548_v56 = vld [vmem:[#allocation8 + $0x1cc] ss:$16 sps:$4 sm:$0xff]  }
 0x146   : > { %1402 = vmatprep.subr.bf16.mxu0 %v3931_v43  ;;  %1495 = vmatprep.subr.bf16.mxu1 %v3933_v44  ;;  %v4530_v43 = vld [vmem:[#allocation8 + $0x16c] ss:$16 sps:$4 sm:$0xff]   ;;  %v4525_v44 = vld [vmem:[#allocation8 + $0x160] ss:$16 sps:$4 sm:$0xff]  }
 0x148   : > { %1403 = vmatpush1.bf16.msra.mxu0 %v3930_v48  ;;  %1496 = vmatpush1.bf16.msra.mxu1 %v3932_v50  ;;  %v4531_v48 = vld [vmem:[#allocation8 + $0x180] ss:$16 sps:$4 sm:$0xff]   ;;  %v4534_v50 = vld [vmem:[#allocation8 + $0x188] ss:$16 sps:$4 sm:$0xff]  }
 0x149   : > { %1404 = vmatprep.subr.bf16.mxu0 %v3939_v51  ;;  %1497 = vmatprep.subr.bf16.mxu1 %v3941_v52  ;;  %v4539_v51 = vld [vmem:[#allocation8 + $0x1a4] ss:$16 sps:$4 sm:$0xff]   ;;  %v4542_v52 = vld [vmem:[#allocation8 + $0x1ac] ss:$16 sps:$4 sm:$0xff]  }
 0x14c   : > { %1405 = vmatpush1.bf16.msra.mxu0 %v3938_v57  ;;  %1498 = vmatpush1.bf16.msra.mxu1 %v3940_v58  ;;  %v4543_v57 = vld [vmem:[#allocation8 + $0x1c0] ss:$16 sps:$4 sm:$0xff]   ;;  %v4546_v58 = vld [vmem:[#allocation8 + $0x1c8] ss:$16 sps:$4 sm:$0xff]  }
 0x14d   : > { %1406 = vmatprep.subr.bf16.mxu0 %v3947_v59  ;;  %1499 = vmatprep.subr.bf16.mxu1 %v3949_v60  ;;  %v4551_v59 = vld [vmem:[#allocation8 + $0x1e4] ss:$16 sps:$4 sm:$0xff]   ;;  %v4554_v60 = vld [vmem:[#allocation8 + $0x1ec] ss:$16 sps:$4 sm:$0xff]  }
 0x150   : > { %1407 = vmatpush1.bf16.msra.mxu0 %v3946_v62  ;;  %1500 = vmatpush1.bf16.msra.mxu1 %v3948_v9  ;;  %v4549_v62 = vld [vmem:[#allocation8 + $0x1e0] ss:$16 sps:$4 sm:$0xff]   ;;  %v4552_v9 = vld [vmem:[#allocation8 + $0x1e8] ss:$16 sps:$4 sm:$0xff]  }
 0x153   : > { %1413 = vmatmul.mubr.bf16.vlgmr.msra.gmra.mrb[24].mxu0 %v5265_v12  ;;  %1506 = vmatmul.mubr.bf16.vlgmr.msra.gmra.mrb[24].mxu1 %v5265_v12  ;;  %v4461_v12 = vld [vmem:[#allocation8 + $0x4] ss:$16 sps:$4 sm:$0xff]  }
 0x154   : > { %3963 = vmatprep.mubr.msk.bf16.mxu0 %vm1181_vm0, %v5269_v19  ;;  %3969 = vmatprep.mubr.msk.bf16.mxu1 %vm1181_vm0, %v5269_v19  ;;  %v4464_v19 = vld [vmem:[#allocation8 + $0xc] ss:$16 sps:$4 sm:$0xff]  }
 0x155   : > { %2848 = vmatprep.subr.bf16.mxu0 %v4461_v12  ;;  %3067 = vmatprep.subr.bf16.mxu1 %v4464_v19  ;;  %v4557_v12 = vld [vmem:[#allocation8 + $0x204] ss:$16 sps:$4 sm:$0xff]   ;;  %v4560_v19 = vld [vmem:[#allocation8 + $0x20c] ss:$16 sps:$4 sm:$0xff]  }
 0x15b   : > { %1423 = vmatmul.mubr.bf16.gmra.mrb[28].mxu0 %v5278_v24  ;;  %1516 = vmatmul.mubr.bf16.gmra.mrb[28].mxu1 %v5278_v24  ;;  %v4459_v24 = vld [vmem:[#allocation8] ss:$16 sps:$4 sm:$0xff]  }
 0x15c   : > { %3964 = vmatprep.mubr.msk.bf16.mxu0 %vm1181_vm0, %v5282_v31  ;;  %3970 = vmatprep.mubr.msk.bf16.mxu1 %vm1181_vm0, %v5282_v31  ;;  %v4462_v31 = vld [vmem:[#allocation8 + $0x8] ss:$16 sps:$4 sm:$0xff]  }
 0x15d   : > { %2849 = vmatpush1.bf16.msra.mxu0 %v4459_v24  ;;  %3068 = vmatpush1.bf16.msra.mxu1 %v4462_v31  ;;  %v581_v24 = vlaneseq }
 0x15f   : > { %v5370_v31 = vshrl.u32 %v581_v24, 7 }
 0x163   : > { %1433 = vmatmul.mubr.bf16.gmra.mrb[32].mxu0 %v5291_v42  ;;  %1526 = vmatmul.mubr.bf16.gmra.mrb[32].mxu1 %v5291_v42  ;;  %v4467_v42 = vld [vmem:[#allocation8 + $0x24] ss:$16 sps:$4 sm:$0xff]  }
 0x164   : > { %3965 = vmatprep.mubr.msk.bf16.mxu0 %vm1181_vm0, %v5295_v49  ;;  %3971 = vmatprep.mubr.msk.bf16.mxu1 %vm1181_vm0, %v5295_v49  ;;  %v4470_v49 = vld [vmem:[#allocation8 + $0x2c] ss:$16 sps:$4 sm:$0xff]  }
 0x165   : > { %2850 = vmatprep.subr.bf16.mxu0 %v4467_v42  ;;  %3069 = vmatprep.subr.bf16.mxu1 %v4470_v49  ;;  %v583_v42 = vsub.s32 0, %v5370_v31  ;;  %v591_v49 = vsub.s32 2, %v5370_v31 }
 0x166   : > { %3070 = vmatpush1.bf16.msra.mxu1 %v4468_v63  ;;  %v587_v63 = vsub.s32 1, %v5370_v31 }
 0x167   : > { %3071 = vmatprep.subr.bf16.mxu1 %v4476_v2 }
 0x16a   : > { %3072 = vmatpush1.bf16.msra.mxu1 %v4474_v4 }
 0x16b   : > { %1443 = vmatmul.mubr.bf16.gmra.mrb[36].mxu0 %v5304_v61  ;;  %1536 = vmatmul.mubr.bf16.gmra.mrb[36].mxu1 %v5304_v61  ;;  %v4465_v61 = vld [vmem:[#allocation8 + $0x20] ss:$16 sps:$4 sm:$0xff]  }
 0x16c   : > { %3966 = vmatprep.mubr.msk.bf16.mxu0 %vm1181_vm0, %v5308_v5  ;;  %3972 = vmatprep.mubr.msk.bf16.mxu1 %vm1181_vm0, %v5308_v5  ;;  %v4479_v5 = vld [vmem:[#allocation8 + $0x64] ss:$16 sps:$4 sm:$0xff]  }
 0x16d   : > { %2851 = vmatpush1.bf16.msra.mxu0 %v4465_v61  ;;  %3073 = vmatprep.subr.bf16.mxu1 %v4482_v6  ;;  %v5374_v61 = vld [vmem:[#allocation7] sm:$0xff] }
 0x16e   : > { %2852 = vmatprep.subr.bf16.mxu0 %v4473_v1  ;;  %3074 = vmatpush1.bf16.msra.mxu1 %v4480_v8  ;;  %v595_v1 = vsub.s32 3, %v5370_v31  ;;  %v5381_v2 = vrot.slane %v5374_v61, %v583_v42  ;;  %v5391_v4 = vrot.slane %v5374_v61, %v587_v63 }
 0x16f   : > { %3075 = vmatprep.subr.bf16.mxu1 %v4488_v11 }
 0x171   : > { %2853 = vmatpush1.bf16.msra.mxu0 %v4471_v3  ;;  %v5386_v3 = vrot.slane %v5374_v61, %v591_v49 }
 0x172   : > { %2854 = vmatprep.subr.bf16.mxu0 %v4479_v5  ;;  %3076 = vmatpush1.bf16.msra.mxu1 %v4486_v14  ;;  %v5396_v5 = vrot.slane %v5374_v61, %v595_v1 }
 0x173   : > { %1453 = vmatmul.mubr.bf16.gmra.mrb[40].mxu0 %v5317_v20  ;;  %1546 = vmatmul.mubr.bf16.gmra.mrb[40].mxu1 %v5317_v20  ;;  %v4497_v20 = vld [vmem:[#allocation8 + $0xc4] ss:$16 sps:$4 sm:$0xff]  }
 0x174   : > { %3967 = vmatprep.mubr.msk.bf16.mxu0 %vm1181_vm0, %v5321_v28  ;;  %3973 = vmatprep.mubr.msk.bf16.mxu1 %vm1181_vm0, %v5321_v28  ;;  %v4504_v28 = vld [vmem:[#allocation8 + $0xe8] ss:$16 sps:$4 sm:$0xff]  }
 0x175   : > { %2855 = vmatpush1.bf16.msra.mxu0 %v4477_v7  ;;  %3077 = vmatprep.subr.bf16.mxu1 %v4494_v16 }
 0x176   : > { %2856 = vmatprep.subr.bf16.mxu0 %v4485_v10  ;;  %3078 = vmatpush1.bf16.msra.mxu1 %v4492_v18 }
 0x177   : > { %3079 = vmatprep.subr.bf16.mxu1 %v4500_v21 }
 0x179   : > { %2857 = vmatpush1.bf16.msra.mxu0 %v4483_v13 }
 0x17a   : > { %2858 = vmatprep.subr.bf16.mxu0 %v4491_v15  ;;  %3080 = vmatpush1.bf16.msra.mxu1 %v4498_v23 }
 0x17b   : > { %1463 = vmatmul.mubr.bf16.gmra.mrb[44].mxu0 %v5330_v40  ;;  %1556 = vmatmul.mubr.bf16.gmra.mrb[44].mxu1 %v5330_v40  ;;  %v4522_v40 = vld [vmem:[#allocation8 + $0x148] ss:$16 sps:$4 sm:$0xff]  }
 0x17c   : > { %3081 = vmatprep.subr.bf16.mxu1 %v4506_v26 }
 0x17d   : > { %2859 = vmatpush1.bf16.msra.mxu0 %v4489_v17 }
 0x17e   : > { %2860 = vmatprep.subr.bf16.mxu0 %v4497_v20  ;;  %3082 = vmatpush1.bf16.msra.mxu1 %v4504_v28 }
 0x17f   : > { %3083 = vmatprep.subr.bf16.mxu1 %v4512_v30 }
 0x181   : > { %2861 = vmatpush1.bf16.msra.mxu0 %v4495_v22 }
 0x182   : > { %2862 = vmatprep.subr.bf16.mxu0 %v4503_v25  ;;  %3084 = vmatpush1.bf16.msra.mxu1 %v4510_v0 }
 0x183   : > { %3085 = vmatprep.subr.bf16.mxu1 %v4518_v34 }
 0x185   : > { %2863 = vmatpush1.bf16.msra.mxu0 %v4501_v27 }
 0x186   : > { %2864 = vmatprep.subr.bf16.mxu0 %v4509_v29  ;;  %3086 = vmatpush1.bf16.msra.mxu1 %v4516_v36 }
 0x187   : > { %3087 = vmatprep.subr.bf16.mxu1 %v4524_v38 }
 0x189   : > { %2865 = vmatpush1.bf16.msra.mxu0 %v4507_v32 }
 0x18a   : > { %2866 = vmatprep.subr.bf16.mxu0 %v4515_v33  ;;  %3088 = vmatpush1.bf16.msra.mxu1 %v4522_v40 }
 0x18b   : > { %3089 = vmatprep.subr.bf16.mxu1 %v4530_v43 }
 0x18d   : > { %2867 = vmatpush1.bf16.msra.mxu0 %v4513_v35 }
 0x18e   : > { %2868 = vmatprep.subr.bf16.mxu0 %v4521_v37  ;;  %3090 = vmatpush1.bf16.msra.mxu1 %v4528_v45 }
 0x18f   : > { %3091 = vmatprep.subr.bf16.mxu1 %v4536_v47 }
 0x191   : > { %2869 = vmatpush1.bf16.msra.mxu0 %v4519_v39 }
 0x192   : > { %2870 = vmatprep.subr.bf16.mxu0 %v4527_v41  ;;  %3092 = vmatpush1.bf16.msra.mxu1 %v4534_v50 }
 0x193   : > { %3093 = vmatprep.subr.bf16.mxu1 %v4542_v52 }
 0x195   : > { %2871 = vmatpush1.bf16.msra.mxu0 %v4525_v44 }
 0x196   : > { %2872 = vmatprep.subr.bf16.mxu0 %v4533_v46  ;;  %3094 = vmatpush1.bf16.msra.mxu1 %v4540_v54 }
 0x197   : > { %3095 = vmatprep.subr.bf16.mxu1 %v4548_v56 }
 0x199   : > { %2873 = vmatpush1.bf16.msra.mxu0 %v4531_v48 }
 0x19a   : > { %2874 = vmatprep.subr.bf16.mxu0 %v4539_v51  ;;  %3096 = vmatpush1.bf16.msra.mxu1 %v4546_v58 }
 0x19b   : > { %3097 = vmatprep.subr.bf16.mxu1 %v4554_v60 }
 0x19d   : > { %2875 = vmatpush1.bf16.msra.mxu0 %v4537_v53 }
 0x19e   : > { %2876 = vmatprep.subr.bf16.mxu0 %v4545_v55  ;;  %3098 = vmatpush1.bf16.msra.mxu1 %v4552_v9 }
 0x19f   : > { %3140 = vmatprep.subr.bf16.mxu1 %v4560_v19 }
 0x1a1   : > { %2877 = vmatpush1.bf16.msra.mxu0 %v4543_v57 }
 0x1a2   : > { %2878 = vmatprep.subr.bf16.mxu0 %v4551_v59 }
 0x1a5   : > { %2879 = vmatpush1.bf16.msra.mxu0 %v4549_v62 }
 0x1a6   : > { %2921 = vmatprep.subr.bf16.mxu0 %v4557_v12 }
 0x1ee   : > { %v1228_v6 = vpop.f32.mrb[0].mxu0  ;;  %v1321_v7 = vpop.f32.mrb[0].mxu1 }
 0x1ef   : > { %v1229_v8 = vadd.f32 %v1228_v6, %v5381_v2  ;;  %v1322_v10 = vadd.f32 %v1321_v7, %v5386_v3  ;;  %v1230_v11 = vpop.f32.mrb[1].mxu0  ;;  %v1323_v13 = vpop.f32.mrb[1].mxu1 }
 0x1f0   : > { %v1231_v14 = vadd.f32 %v1230_v11, %v5391_v4  ;;  %v1324_v15 = vadd.f32 %v1323_v13, %v5396_v5  ;;  %v1232_v16 = vpop.f32.mrb[2].mxu0  ;;  %v1325_v17 = vpop.f32.mrb[2].mxu1 }
 0x1f1   : > { %v1566_v18 = vmax.f32 %v1229_v8, %v1322_v10  ;;  %v1233_v20 = vadd.f32 %v1232_v16, %v5381_v2  ;;  %v1326_v21 = vadd.f32 %v1325_v17, %v5386_v3  ;;  %v1234_v22 = vpop.f32.mrb[3].mxu0  ;;  %v1327_v23 = vpop.f32.mrb[3].mxu1 }
 0x1f2   : > { %v1567_v25 = vmax.f32 %v1231_v14, %v1324_v15  ;;  %v1235_v26 = vadd.f32 %v1234_v22, %v5391_v4  ;;  %v1328_v27 = vadd.f32 %v1327_v23, %v5396_v5 }
 0x1f3   : > { %v1568_v28 = vmax.f32 %v1233_v20, %v1326_v21 }
 0x1f4   : > { %v1614_v29 = vmax.f32 %v1566_v18, %v1567_v25  ;;  %v1569_v30 = vmax.f32 %v1235_v26, %v1328_v27 }
 0x1f6   : > { %v1615_v32 = vmax.f32 %v1568_v28, %v1569_v30  ;;  %v1238_v0 = vpop.f32.mrb[4].mxu0  ;;  %v1331_v33 = vpop.f32.mrb[4].mxu1  ;;  %v1638_v38 = vmax.f32 %v1614_v29, 0.0 }
 0x1f7   : > { %v1239_v34 = vadd.f32 %v1238_v0, %v5381_v2  ;;  %v1332_v35 = vadd.f32 %v1331_v33, %v5386_v3  ;;  %v1240_v36 = vpop.f32.mrb[5].mxu0  ;;  %v1333_v37 = vpop.f32.mrb[5].mxu1 }
 0x1f8   : > { %v1640_v39 = vmax.f32 %v1615_v32, 0.0  ;;  %v1241_v40 = vadd.f32 %v1240_v36, %v5391_v4  ;;  %v1334_v41 = vadd.f32 %v1333_v37, %v5396_v5  ;;  %v1242_v43 = vpop.f32.mrb[6].mxu0  ;;  %v1335_v44 = vpop.f32.mrb[6].mxu1 }
 0x1f9   : > { %v1570_v45 = vmax.f32 %v1239_v34, %v1332_v35  ;;  %v1243_v46 = vadd.f32 %v1242_v43, %v5381_v2  ;;  %v1336_v47 = vadd.f32 %v1335_v44, %v5386_v3  ;;  %v1244_v48 = vpop.f32.mrb[7].mxu0  ;;  %v1337_v50 = vpop.f32.mrb[7].mxu1 }
 0x1fa   : > { %v5412_v51 = vpack.c.bf16 %v1640_v39, %v1638_v38  ;;  %v1571_v52 = vmax.f32 %v1241_v40, %v1334_v41  ;;  %v1245_v53 = vadd.f32 %v1244_v48, %v5391_v4  ;;  %v1338_v54 = vadd.f32 %v1337_v50, %v5396_v5 }
 0x1fb   : > { %v1572_v55 = vmax.f32 %v1243_v46, %v1336_v47 }
 0x1fc   : > { %v1616_v56 = vmax.f32 %v1570_v45, %v1571_v52  ;;  %v1573_v57 = vmax.f32 %v1245_v53, %v1338_v54 }
 0x1fe   : > { %v1642_v58 = vmax.f32 %v1616_v56, 0.0  ;;  %v1617_v59 = vmax.f32 %v1572_v55, %v1573_v57  ;;  %v1248_v60 = vpop.f32.mrb[8].mxu0  ;;  %v1341_v62 = vpop.f32.mrb[8].mxu1 }
 0x1ff   : > { %v1249_v9 = vadd.f32 %v1248_v60, %v5381_v2  ;;  %v1342_v12 = vadd.f32 %v1341_v62, %v5386_v3  ;;  %v1250_v19 = vpop.f32.mrb[9].mxu0  ;;  %v1343_v24 = vpop.f32.mrb[9].mxu1 }
 0x200   : > { %v1644_v6 = vmax.f32 %v1617_v59, 0.0  ;;  %v1251_v7 = vadd.f32 %v1250_v19, %v5391_v4  ;;  %v1344_v8 = vadd.f32 %v1343_v24, %v5396_v5  ;;  %v1252_v10 = vpop.f32.mrb[10].mxu0  ;;  %v1345_v11 = vpop.f32.mrb[10].mxu1 }
 0x201   : > { %v1574_v13 = vmax.f32 %v1249_v9, %v1342_v12  ;;  %v1253_v14 = vadd.f32 %v1252_v10, %v5381_v2  ;;  %v1346_v15 = vadd.f32 %v1345_v11, %v5386_v3  ;;  %v1254_v16 = vpop.f32.mrb[11].mxu0  ;;  %v1347_v17 = vpop.f32.mrb[11].mxu1 }
 0x202   : > { %v5422_v18 = vpack.c.bf16 %v1644_v6, %v1642_v58  ;;  %v1575_v20 = vmax.f32 %v1251_v7, %v1344_v8  ;;  %v1255_v21 = vadd.f32 %v1254_v16, %v5391_v4  ;;  %v1348_v22 = vadd.f32 %v1347_v17, %v5396_v5 }
 0x203   : > { %v1576_v23 = vmax.f32 %v1253_v14, %v1346_v15 }
 0x204   : > { %v1618_v25 = vmax.f32 %v1574_v13, %v1575_v20  ;;  %v1577_v26 = vmax.f32 %v1255_v21, %v1348_v22 }
 0x206   : > { %v1646_v27 = vmax.f32 %v1618_v25, 0.0  ;;  %v1619_v28 = vmax.f32 %v1576_v23, %v1577_v26  ;;  %v1258_v29 = vpop.f32.mrb[12].mxu0  ;;  %v1351_v30 = vpop.f32.mrb[12].mxu1 }
 0x207   : > { %v1259_v32 = vadd.f32 %v1258_v29, %v5381_v2  ;;  %v1352_v0 = vadd.f32 %v1351_v30, %v5386_v3  ;;  %v1260_v33 = vpop.f32.mrb[13].mxu0  ;;  %v1353_v34 = vpop.f32.mrb[13].mxu1 }
 0x208   : > { %v1648_v35 = vmax.f32 %v1619_v28, 0.0  ;;  %v1261_v36 = vadd.f32 %v1260_v33, %v5391_v4  ;;  %v1354_v37 = vadd.f32 %v1353_v34, %v5396_v5  ;;  %v1262_v38 = vpop.f32.mrb[14].mxu0  ;;  %v1355_v39 = vpop.f32.mrb[14].mxu1 }
 0x209   : > { %v1578_v40 = vmax.f32 %v1259_v32, %v1352_v0  ;;  %v1263_v41 = vadd.f32 %v1262_v38, %v5381_v2  ;;  %v1356_v43 = vadd.f32 %v1355_v39, %v5386_v3  ;;  %v1264_v44 = vpop.f32.mrb[15].mxu0  ;;  %v1357_v45 = vpop.f32.mrb[15].mxu1 }
 0x20a   : > { %v5432_v46 = vpack.c.bf16 %v1648_v35, %v1646_v27  ;;  %v1579_v47 = vmax.f32 %v1261_v36, %v1354_v37  ;;  %v1265_v48 = vadd.f32 %v1264_v44, %v5391_v4  ;;  %v1358_v50 = vadd.f32 %v1357_v45, %v5396_v5 }
 0x20b   : > { %v1580_v52 = vmax.f32 %v1263_v41, %v1356_v43 }
 0x20c   : > { %v1620_v53 = vmax.f32 %v1578_v40, %v1579_v47  ;;  %v1581_v54 = vmax.f32 %v1265_v48, %v1358_v50 }
 0x20e   : > { %v1650_v55 = vmax.f32 %v1620_v53, 0.0  ;;  %v1621_v56 = vmax.f32 %v1580_v52, %v1581_v54  ;;  %v1268_v57 = vpop.f32.mrb[16].mxu0  ;;  %v1361_v58 = vpop.f32.mrb[16].mxu1 }
 0x20f   : > { %v1269_v59 = vadd.f32 %v1268_v57, %v5381_v2  ;;  %v1362_v60 = vadd.f32 %v1361_v58, %v5386_v3  ;;  %v1270_v62 = vpop.f32.mrb[17].mxu0  ;;  %v1363_v9 = vpop.f32.mrb[17].mxu1  ;;  %v611_v58 = vsub.s32 7, %v5370_v31 }
 0x210   : > { %v1652_v12 = vmax.f32 %v1621_v56, 0.0  ;;  %v1271_v19 = vadd.f32 %v1270_v62, %v5391_v4  ;;  %v1364_v24 = vadd.f32 %v1363_v9, %v5396_v5  ;;  %v1272_v6 = vpop.f32.mrb[18].mxu0  ;;  %v1365_v7 = vpop.f32.mrb[18].mxu1  ;;  %v599_v56 = vsub.s32 4, %v5370_v31 }
 0x211   : > { %v1582_v8 = vmax.f32 %v1269_v59, %v1362_v60  ;;  %v1273_v10 = vadd.f32 %v1272_v6, %v5381_v2  ;;  %v1366_v11 = vadd.f32 %v1365_v7, %v5386_v3  ;;  %v1274_v13 = vpop.f32.mrb[19].mxu0  ;;  %v1367_v14 = vpop.f32.mrb[19].mxu1  ;;  %v5472_v62 = vrot.slane %v5374_v61, %v611_v58 }
 0x212   : > { %v5442_v15 = vpack.c.bf16 %v1652_v12, %v1650_v55  ;;  %v1583_v16 = vmax.f32 %v1271_v19, %v1364_v24  ;;  %v1275_v17 = vadd.f32 %v1274_v13, %v5391_v4  ;;  %v1368_v20 = vadd.f32 %v1367_v14, %v5396_v5 }
 0x213   : > { %v1584_v21 = vmax.f32 %v1273_v10, %v1366_v11 }
 0x214   : > { %v1622_v22 = vmax.f32 %v1582_v8, %v1583_v16  ;;  %v1585_v23 = vmax.f32 %v1275_v17, %v1368_v20 }
 0x216   : > { %v1654_v25 = vmax.f32 %v1622_v22, 0.0  ;;  %v1623_v26 = vmax.f32 %v1584_v21, %v1585_v23  ;;  %v1278_v27 = vpop.f32.mrb[20].mxu0  ;;  %v1371_v28 = vpop.f32.mrb[20].mxu1 }
 0x217   : > { %v1279_v29 = vadd.f32 %v1278_v27, %v5381_v2  ;;  %v1372_v30 = vadd.f32 %v1371_v28, %v5386_v3  ;;  %v1280_v32 = vpop.f32.mrb[21].mxu0  ;;  %v1373_v0 = vpop.f32.mrb[21].mxu1 }
 0x218   : > { %v1656_v33 = vmax.f32 %v1623_v26, 0.0  ;;  %v1281_v34 = vadd.f32 %v1280_v32, %v5391_v4  ;;  %v1374_v35 = vadd.f32 %v1373_v0, %v5396_v5  ;;  %v1282_v36 = vpop.f32.mrb[22].mxu0  ;;  %v1375_v37 = vpop.f32.mrb[22].mxu1 }
 0x219   : > { %v1586_v38 = vmax.f32 %v1279_v29, %v1372_v30  ;;  %v1283_v39 = vadd.f32 %v1282_v36, %v5381_v2  ;;  %v1376_v40 = vadd.f32 %v1375_v37, %v5386_v3  ;;  %v1284_v41 = vpop.f32.mrb[23].mxu0  ;;  %v1377_v43 = vpop.f32.mrb[23].mxu1  ;;  %v607_v2 = vsub.s32 6, %v5370_v31 }
 0x21a   : > { %v5452_v44 = vpack.c.bf16 %v1656_v33, %v1654_v25  ;;  %v1587_v45 = vmax.f32 %v1281_v34, %v1374_v35  ;;  %v1285_v47 = vadd.f32 %v1284_v41, %v5391_v4  ;;  %v1378_v48 = vadd.f32 %v1377_v43, %v5396_v5 }
 0x21b   : > { %v1588_v50 = vmax.f32 %v1283_v39, %v1376_v40  ;;  %v603_v3 = vsub.s32 5, %v5370_v31  ;;  %v5463_v4 = vrot.slane %v5374_v61, %v599_v56  ;;  %v5466_v5 = vrot.slane %v5374_v61, %v607_v2  ;;  %v4558_v56 = vld [vmem:[#allocation8 + $0x208] ss:$16 sps:$4 sm:$0xff]  }
 0x21c   : > { %v1624_v52 = vmax.f32 %v1586_v38, %v1587_v45  ;;  %v1589_v53 = vmax.f32 %v1285_v47, %v1378_v48 }
 0x21d   : > { %v5469_v60 = vrot.slane %v5374_v61, %v603_v3  ;;  %v4566_v3 = vld [vmem:[#allocation8 + $0x22c] ss:$16 sps:$4 sm:$0xff]  }
 0x21e   : > { %v1658_v54 = vmax.f32 %v1624_v52, 0.0  ;;  %v1625_v55 = vmax.f32 %v1588_v50, %v1589_v53 }
 0x220   : > { %v1660_v57 = vmax.f32 %v1625_v55, 0.0  ;;  %v4555_v55 = vld [vmem:[#allocation8 + $0x200] ss:$16 sps:$4 sm:$0xff]  }
 0x222   : > { %v5460_v59 = vpack.c.bf16 %v1660_v57, %v1658_v54  ;;  %v4563_v57 = vld [vmem:[#allocation8 + $0x224] ss:$16 sps:$4 sm:$0xff]  }
 0x226   : > { %v1414_v9 = vpop.f32.mrb[24].mxu0  ;;  %v1507_v12 = vpop.f32.mrb[24].mxu1 }
 0x227   : > { %v1415_v19 = vadd.f32 %v1414_v9, %v5463_v4  ;;  %v1508_v24 = vadd.f32 %v1507_v12, %v5466_v5  ;;  %v1416_v6 = vpop.f32.mrb[25].mxu0  ;;  %v1509_v7 = vpop.f32.mrb[25].mxu1 }
 0x228   : > { %v1417_v8 = vadd.f32 %v1416_v6, %v5469_v60  ;;  %v1510_v10 = vadd.f32 %v1509_v7, %v5472_v62  ;;  %v1418_v11 = vpop.f32.mrb[26].mxu0  ;;  %v1511_v13 = vpop.f32.mrb[26].mxu1  ;;  %v4561_v6 = vld [vmem:[#allocation8 + $0x220] ss:$16 sps:$4 sm:$0xff]  }
 0x229   : > { %v1590_v14 = vmax.f32 %v1415_v19, %v1508_v24  ;;  %v1419_v16 = vadd.f32 %v1418_v11, %v5463_v4  ;;  %v1512_v61 = vadd.f32 %v1511_v13, %v5466_v5  ;;  %v1420_v17 = vpop.f32.mrb[27].mxu0  ;;  %v1513_v20 = vpop.f32.mrb[27].mxu1  ;;  %v4564_v13 = vld [vmem:[#allocation8 + $0x228] ss:$16 sps:$4 sm:$0xff]  }
 0x22a   : > { %v1591_v21 = vmax.f32 %v1417_v8, %v1510_v10  ;;  %v1421_v22 = vadd.f32 %v1420_v17, %v5469_v60  ;;  %v1514_v23 = vadd.f32 %v1513_v20, %v5472_v62 }
 0x22b   : > { %v1592_v25 = vmax.f32 %v1419_v16, %v1512_v61 }
 0x22c   : > { %v1626_v26 = vmax.f32 %v1590_v14, %v1591_v21  ;;  %v1593_v27 = vmax.f32 %v1421_v22, %v1514_v23  ;;  %v4569_v14 = vld [vmem:[#allocation8 + $0x244] ss:$16 sps:$4 sm:$0xff]  }
 0x22e   : > { %v1627_v28 = vmax.f32 %v1592_v25, %v1593_v27  ;;  %v1424_v29 = vpop.f32.mrb[28].mxu0  ;;  %v1517_v30 = vpop.f32.mrb[28].mxu1  ;;  %v1639_v35 = vmax.f32 %v1626_v26, 0.0 }
 0x22f   : > { %v1425_v32 = vadd.f32 %v1424_v29, %v5463_v4  ;;  %v1518_v0 = vadd.f32 %v1517_v30, %v5466_v5  ;;  %v1426_v33 = vpop.f32.mrb[29].mxu0  ;;  %v1519_v34 = vpop.f32.mrb[29].mxu1 }
 0x230   : > { %v1641_v36 = vmax.f32 %v1627_v28, 0.0  ;;  %v1427_v37 = vadd.f32 %v1426_v33, %v5469_v60  ;;  %v1520_v38 = vadd.f32 %v1519_v34, %v5472_v62  ;;  %v1428_v39 = vpop.f32.mrb[30].mxu0  ;;  %v1521_v40 = vpop.f32.mrb[30].mxu1  ;;  %v4572_v28 = vld [vmem:[#allocation8 + $0x24c] ss:$16 sps:$4 sm:$0xff]  }
 0x231   : > { %v1594_v41 = vmax.f32 %v1425_v32, %v1518_v0  ;;  %v1429_v43 = vadd.f32 %v1428_v39, %v5463_v4  ;;  %v1522_v45 = vadd.f32 %v1521_v40, %v5466_v5  ;;  %v1430_v47 = vpop.f32.mrb[31].mxu0  ;;  %v1523_v48 = vpop.f32.mrb[31].mxu1  ;;  %v4567_v33 = vld [vmem:[#allocation8 + $0x240] ss:$16 sps:$4 sm:$0xff]   ;;  %v4578_v39 = vld [vmem:[#allocation8 + $0x26c] ss:$16 sps:$4 sm:$0xff]  }
 0x232   : > { %v1595_v50 = vmax.f32 %v1427_v37, %v1520_v38  ;;  %v1431_v52 = vadd.f32 %v1430_v47, %v5469_v60  ;;  %v1524_v53 = vadd.f32 %v1523_v48, %v5472_v62  ;;  %v1663_v54 = vpack.c.bf16 %v1641_v36, %v1639_v35  ;;  %v4570_v35 = vld [vmem:[#allocation8 + $0x248] ss:$16 sps:$4 sm:$0xff]   ;;  %v4575_v36 = vld [vmem:[#allocation8 + $0x264] ss:$16 sps:$4 sm:$0xff]  }
 0x233   : > { %v1596_v2 = vmax.f32 %v1429_v43, %v1522_v45  ;;  %v4573_v45 = vld [vmem:[#allocation8 + $0x260] ss:$16 sps:$4 sm:$0xff]  }
 0x234   : > { %v1628_v58 = vmax.f32 %v1594_v41, %v1595_v50  ;;  %v1597_v9 = vmax.f32 %v1431_v52, %v1524_v53  ;;  %2880 = vmatprep.mubr.bf16.mxu0 %v1663_v54  ;;  %3099 = vmatprep.mubr.bf16.mxu1 %v1663_v54  ;;  %v4576_v53 = vld [vmem:[#allocation8 + $0x268] ss:$16 sps:$4 sm:$0xff]   ;;  %v4581_v54 = vld [vmem:[#allocation8 + $0x284] ss:$16 sps:$4 sm:$0xff]  }
 0x235   : > { %2881 = vmatmul.mubr.bf16.vlgmr.msra.gmra.mrb[48].mxu0 %v5412_v51  ;;  %3100 = vmatmul.mubr.bf16.vlgmr.msra.gmra.mrb[48].mxu1 %v5412_v51 }
 0x236   : > { %v1629_v12 = vmax.f32 %v1596_v2, %v1597_v9  ;;  %2922 = vmatpush1.bf16.msra.mxu0 %v4555_v55  ;;  %3141 = vmatpush1.bf16.msra.mxu1 %v4558_v56  ;;  %v1434_v19 = vpop.f32.mrb[32].mxu0  ;;  %v1527_v24 = vpop.f32.mrb[32].mxu1  ;;  %v1643_v16 = vmax.f32 %v1628_v58, 0.0 }
 0x237   : > { %v1435_v7 = vadd.f32 %v1434_v19, %v5463_v4  ;;  %v1528_v8 = vadd.f32 %v1527_v24, %v5466_v5  ;;  %v1436_v10 = vpop.f32.mrb[33].mxu0  ;;  %v1529_v11 = vpop.f32.mrb[33].mxu1  ;;  %2923 = vmatprep.subr.bf16.mxu0 %v4563_v57  ;;  %3142 = vmatprep.subr.bf16.mxu1 %v4566_v3 }
 0x238   : > { %v1645_v61 = vmax.f32 %v1629_v12, 0.0  ;;  %v1437_v51 = vadd.f32 %v1436_v10, %v5469_v60  ;;  %v1530_v17 = vadd.f32 %v1529_v11, %v5472_v62  ;;  %v1438_v20 = vpop.f32.mrb[34].mxu0  ;;  %v1531_v21 = vpop.f32.mrb[34].mxu1 }
 0x239   : > { %v1598_v22 = vmax.f32 %v1435_v7, %v1528_v8  ;;  %v1439_v23 = vadd.f32 %v1438_v20, %v5463_v4  ;;  %v1532_v25 = vadd.f32 %v1531_v21, %v5466_v5  ;;  %v1440_v26 = vpop.f32.mrb[35].mxu0  ;;  %v1533_v27 = vpop.f32.mrb[35].mxu1  ;;  %v4584_v7 = vld [vmem:[#allocation8 + $0x28c] ss:$16 sps:$4 sm:$0xff]  }
 0x23a   : > { %v5498_v29 = vpack.c.bf16 %v1645_v61, %v1643_v16  ;;  %v1599_v30 = vmax.f32 %v1437_v51, %v1530_v17  ;;  %v1441_v32 = vadd.f32 %v1440_v26, %v5469_v60  ;;  %v1534_v0 = vadd.f32 %v1533_v27, %v5472_v62  ;;  %2924 = vmatpush1.bf16.msra.mxu0 %v4561_v6  ;;  %v4582_v61 = vld [vmem:[#allocation8 + $0x288] ss:$16 sps:$4 sm:$0xff]   ;;  %v4587_v51 = vld [vmem:[#allocation8 + $0x2a4] ss:$16 sps:$4 sm:$0xff]   ;;  %v4590_v21 = vld [vmem:[#allocation8 + $0x2ac] ss:$16 sps:$4 sm:$0xff]  }
 0x23b   : > { %v1600_v34 = vmax.f32 %v1439_v23, %v1532_v25  ;;  %3143 = vmatpush1.bf16.msra.mxu1 %v4564_v13  ;;  %2925 = vmatprep.subr.bf16.mxu0 %v4569_v14  ;;  %v4579_v14 = vld [vmem:[#allocation8 + $0x280] ss:$16 sps:$4 sm:$0xff]  }
 0x23c   : > { %v1630_v37 = vmax.f32 %v1598_v22, %v1599_v30  ;;  %v1601_v38 = vmax.f32 %v1441_v32, %v1534_v0  ;;  %2890 = vmatprep.mubr.bf16.mxu0 %v5498_v29  ;;  %3109 = vmatprep.mubr.bf16.mxu1 %v5498_v29  ;;  %v4585_v26 = vld [vmem:[#allocation8 + $0x2a0] ss:$16 sps:$4 sm:$0xff]   ;;  %v4588_v0 = vld [vmem:[#allocation8 + $0x2a8] ss:$16 sps:$4 sm:$0xff]  }
 0x23d   : > { %3144 = vmatprep.subr.bf16.mxu1 %v4572_v28  ;;  %2891 = vmatmul.mubr.bf16.gmra.mrb[52].mxu0 %v5422_v18 }
 0x23e   : > { %v1631_v40 = vmax.f32 %v1600_v34, %v1601_v38  ;;  %2926 = vmatpush1.bf16.msra.mxu0 %v4567_v33  ;;  %3110 = vmatmul.mubr.bf16.gmra.mrb[52].mxu1 %v5422_v18  ;;  %v1444_v41 = vpop.f32.mrb[36].mxu0  ;;  %v1537_v43 = vpop.f32.mrb[36].mxu1  ;;  %v1647_v55 = vmax.f32 %v1630_v37, 0.0  ;;  %v4593_v33 = vld [vmem:[#allocation8 + $0x2c4] ss:$16 sps:$4 sm:$0xff]  }
 0x23f   : > { %3145 = vmatpush1.bf16.msra.mxu1 %v4570_v35  ;;  %v1445_v47 = vadd.f32 %v1444_v41, %v5463_v4  ;;  %v1538_v48 = vadd.f32 %v1537_v43, %v5466_v5  ;;  %v1446_v50 = vpop.f32.mrb[37].mxu0  ;;  %v1539_v52 = vpop.f32.mrb[37].mxu1  ;;  %2927 = vmatprep.subr.bf16.mxu0 %v4575_v36 }
 0x240   : > { %v1649_v56 = vmax.f32 %v1631_v40, 0.0  ;;  %v1447_v2 = vadd.f32 %v1446_v50, %v5469_v60  ;;  %v1540_v57 = vadd.f32 %v1539_v52, %v5472_v62  ;;  %v1448_v3 = vpop.f32.mrb[38].mxu0  ;;  %v1541_v58 = vpop.f32.mrb[38].mxu1  ;;  %3146 = vmatprep.subr.bf16.mxu1 %v4578_v39 }
 0x241   : > { %v1602_v9 = vmax.f32 %v1445_v47, %v1538_v48  ;;  %v1449_v12 = vadd.f32 %v1448_v3, %v5463_v4  ;;  %v1542_v19 = vadd.f32 %v1541_v58, %v5466_v5  ;;  %v1450_v24 = vpop.f32.mrb[39].mxu0  ;;  %v1543_v6 = vpop.f32.mrb[39].mxu1  ;;  %v4596_v48 = vld [vmem:[#allocation8 + $0x2cc] ss:$16 sps:$4 sm:$0xff]   ;;  %v4599_v58 = vld [vmem:[#allocation8 + $0x2e4] ss:$16 sps:$4 sm:$0xff]  }
 0x242   : > { %v5512_v8 = vpack.c.bf16 %v1649_v56, %v1647_v55  ;;  %v1603_v10 = vmax.f32 %v1447_v2, %v1540_v57  ;;  %v1451_v11 = vadd.f32 %v1450_v24, %v5469_v60  ;;  %v1544_v13 = vadd.f32 %v1543_v6, %v5472_v62  ;;  %2928 = vmatpush1.bf16.msra.mxu0 %v4573_v45  ;;  %v4591_v55 = vld [vmem:[#allocation8 + $0x2c0] ss:$16 sps:$4 sm:$0xff]   ;;  %v4594_v2 = vld [vmem:[#allocation8 + $0x2c8] ss:$16 sps:$4 sm:$0xff]  }
 0x243   : > { %v1604_v16 = vmax.f32 %v1449_v12, %v1542_v19  ;;  %3147 = vmatpush1.bf16.msra.mxu1 %v4576_v53  ;;  %2929 = vmatprep.subr.bf16.mxu0 %v4581_v54  ;;  %v4597_v6 = vld [vmem:[#allocation8 + $0x2e0] ss:$16 sps:$4 sm:$0xff]  }
 0x244   : > { %v1632_v17 = vmax.f32 %v1602_v9, %v1603_v10  ;;  %v1605_v20 = vmax.f32 %v1451_v11, %v1544_v13  ;;  %2900 = vmatprep.mubr.bf16.mxu0 %v5512_v8  ;;  %3119 = vmatprep.mubr.bf16.mxu1 %v5512_v8  ;;  %v4602_v9 = vld [vmem:[#allocation8 + $0x2ec] ss:$16 sps:$4 sm:$0xff]  }
 0x245   : > { %3148 = vmatprep.subr.bf16.mxu1 %v4584_v7  ;;  %2901 = vmatmul.mubr.bf16.gmra.mrb[56].mxu0 %v5432_v46 }
 0x246   : > { %v1633_v22 = vmax.f32 %v1604_v16, %v1605_v20  ;;  %2930 = vmatpush1.bf16.msra.mxu0 %v4579_v14  ;;  %3120 = vmatmul.mubr.bf16.gmra.mrb[56].mxu1 %v5432_v46  ;;  %v1454_v23 = vpop.f32.mrb[40].mxu0  ;;  %v1547_v25 = vpop.f32.mrb[40].mxu1  ;;  %v1651_v34 = vmax.f32 %v1632_v17, 0.0  ;;  %v4600_v14 = vld [vmem:[#allocation8 + $0x2e8] ss:$16 sps:$4 sm:$0xff]  }
 0x247   : > { %3149 = vmatpush1.bf16.msra.mxu1 %v4582_v61  ;;  %v1455_v27 = vadd.f32 %v1454_v23, %v5463_v4  ;;  %v1548_v28 = vadd.f32 %v1547_v25, %v5466_v5  ;;  %v1456_v30 = vpop.f32.mrb[41].mxu0  ;;  %v1549_v32 = vpop.f32.mrb[41].mxu1  ;;  %2931 = vmatprep.subr.bf16.mxu0 %v4587_v51  ;;  %v4605_v16 = vld [vmem:[#allocation8 + $0x304] ss:$16 sps:$4 sm:$0xff]   ;;  %v4608_v23 = vld [vmem:[#allocation8 + $0x30c] ss:$16 sps:$4 sm:$0xff]  }
 0x248   : > { %v1653_v35 = vmax.f32 %v1633_v22, 0.0  ;;  %v1457_v36 = vadd.f32 %v1456_v30, %v5469_v60  ;;  %v1550_v37 = vadd.f32 %v1549_v32, %v5472_v62  ;;  %v1458_v38 = vpop.f32.mrb[42].mxu0  ;;  %v1551_v39 = vpop.f32.mrb[42].mxu1  ;;  %3150 = vmatprep.subr.bf16.mxu1 %v4590_v21 }
 0x249   : > { %v1606_v40 = vmax.f32 %v1455_v27, %v1548_v28  ;;  %v1459_v41 = vadd.f32 %v1458_v38, %v5463_v4  ;;  %v1552_v43 = vadd.f32 %v1551_v39, %v5466_v5  ;;  %v1460_v45 = vpop.f32.mrb[43].mxu0  ;;  %v1553_v47 = vpop.f32.mrb[43].mxu1 }
 0x24a   : > { %v5526_v50 = vpack.c.bf16 %v1653_v35, %v1651_v34  ;;  %v1607_v52 = vmax.f32 %v1457_v36, %v1550_v37  ;;  %v1461_v53 = vadd.f32 %v1460_v45, %v5469_v60  ;;  %v1554_v54 = vadd.f32 %v1553_v47, %v5472_v62  ;;  %2932 = vmatpush1.bf16.msra.mxu0 %v4585_v26  ;;  %v4603_v34 = vld [vmem:[#allocation8 + $0x300] ss:$16 sps:$4 sm:$0xff]   ;;  %v4606_v36 = vld [vmem:[#allocation8 + $0x308] ss:$16 sps:$4 sm:$0xff]   ;;  %v4611_v37 = vld [vmem:[#allocation8 + $0x324] ss:$16 sps:$4 sm:$0xff]  }
 0x24b   : > { %v1608_v56 = vmax.f32 %v1459_v41, %v1552_v43  ;;  %3151 = vmatpush1.bf16.msra.mxu1 %v4588_v0  ;;  %2933 = vmatprep.subr.bf16.mxu0 %v4593_v33  ;;  %v4612_v41 = vld [vmem:[#allocation8 + $0x328] ss:$16 sps:$4 sm:$0xff]   ;;  %v4620_v45 = vld [vmem:[#allocation8 + $0x34c] ss:$16 sps:$4 sm:$0xff]   ;;  %v4615_v47 = vld [vmem:[#allocation8 + $0x340] ss:$16 sps:$4 sm:$0xff]  }
 0x24c   : > { %v1634_v57 = vmax.f32 %v1606_v40, %v1607_v52  ;;  %v1609_v3 = vmax.f32 %v1461_v53, %v1554_v54  ;;  %2910 = vmatprep.mubr.bf16.mxu0 %v5526_v50  ;;  %3129 = vmatprep.mubr.bf16.mxu1 %v5526_v50  ;;  %v4609_v40 = vld [vmem:[#allocation8 + $0x320] ss:$16 sps:$4 sm:$0xff]   ;;  %v4618_v52 = vld [vmem:[#allocation8 + $0x348] ss:$16 sps:$4 sm:$0xff]   ;;  %v4623_v53 = vld [vmem:[#allocation8 + $0x364] ss:$16 sps:$4 sm:$0xff]  }
 0x24d   : > { %3152 = vmatprep.subr.bf16.mxu1 %v4596_v48  ;;  %2911 = vmatmul.mubr.bf16.gmra.mrb[60].mxu0 %v5442_v15  ;;  %v4626_v54 = vld [vmem:[#allocation8 + $0x36c] ss:$16 sps:$4 sm:$0xff]  }
 0x24e   : > { %v1635_v12 = vmax.f32 %v1608_v56, %v1609_v3  ;;  %2934 = vmatpush1.bf16.msra.mxu0 %v4591_v55  ;;  %3130 = vmatmul.mubr.bf16.gmra.mrb[60].mxu1 %v5442_v15  ;;  %v1464_v19 = vpop.f32.mrb[44].mxu0  ;;  %v1557_v24 = vpop.f32.mrb[44].mxu1  ;;  %v1655_v61 = vmax.f32 %v1634_v57, 0.0  ;;  %v4621_v55 = vld [vmem:[#allocation8 + $0x360] ss:$16 sps:$4 sm:$0xff]  }
 0x24f   : > { %3153 = vmatpush1.bf16.msra.mxu1 %v4594_v2  ;;  %v1465_v7 = vadd.f32 %v1464_v19, %v5463_v4  ;;  %v1558_v10 = vadd.f32 %v1557_v24, %v5466_v5  ;;  %2953 = vmatprep.mubr.bf16.mxu0 %v5498_v29  ;;  %v1466_v11 = vpop.f32.mrb[45].mxu0  ;;  %v1559_v13 = vpop.f32.mrb[45].mxu1  ;;  %v4624_v56 = vld [vmem:[#allocation8 + $0x368] ss:$16 sps:$4 sm:$0xff]   ;;  %v4629_v2 = vld [vmem:[#allocation8 + $0x384] ss:$16 sps:$4 sm:$0xff]  }
 0x250   : > { %v1657_v51 = vmax.f32 %v1635_v12, 0.0  ;;  %3172 = vmatprep.mubr.bf16.mxu1 %v5498_v29  ;;  %v1467_v17 = vadd.f32 %v1466_v11, %v5469_v60  ;;  %v1560_v20 = vadd.f32 %v1559_v13, %v5472_v62  ;;  %v1468_v21 = vpop.f32.mrb[46].mxu0  ;;  %v1561_v22 = vpop.f32.mrb[46].mxu1  ;;  %2935 = vmatprep.subr.bf16.mxu0 %v4599_v58  ;;  %v4632_v57 = vld [vmem:[#allocation8 + $0x38c] ss:$16 sps:$4 sm:$0xff]  }
 0x251   : > { %v1610_v25 = vmax.f32 %v1465_v7, %v1558_v10  ;;  %v1469_v26 = vadd.f32 %v1468_v21, %v5463_v4  ;;  %v1562_v27 = vadd.f32 %v1561_v22, %v5466_v5  ;;  %3154 = vmatprep.subr.bf16.mxu1 %v4602_v9  ;;  %v1470_v28 = vpop.f32.mrb[47].mxu0  ;;  %v1563_v30 = vpop.f32.mrb[47].mxu1  ;;  %v4614_v5 = vld [vmem:[#allocation8 + $0x32c] ss:$16 sps:$4 sm:$0xff]   ;;  %v4627_v3 = vld [vmem:[#allocation8 + $0x380] ss:$16 sps:$4 sm:$0xff]  }
 0x252   : > { %v5542_v32 = vpack.c.bf16 %v1657_v51, %v1655_v61  ;;  %v1611_v0 = vmax.f32 %v1467_v17, %v1560_v20  ;;  %v1471_v29 = vadd.f32 %v1470_v28, %v5469_v60  ;;  %v1564_v33 = vadd.f32 %v1563_v30, %v5472_v62  ;;  %2936 = vmatpush1.bf16.msra.mxu0 %v4597_v6  ;;  %v4617_v60 = vld [vmem:[#allocation8 + $0x344] ss:$16 sps:$4 sm:$0xff]   ;;  %v4630_v58 = vld [vmem:[#allocation8 + $0x388] ss:$16 sps:$4 sm:$0xff]   ;;  %v4638_v12 = vld [vmem:[#allocation8 + $0x3ac] ss:$16 sps:$4 sm:$0xff]  }
 0x253   : > { %v1612_v35 = vmax.f32 %v1469_v26, %v1562_v27  ;;  %3155 = vmatpush1.bf16.msra.mxu1 %v4600_v14  ;;  %2937 = vmatprep.subr.bf16.mxu0 %v4605_v16  ;;  %v4635_v9 = vld [vmem:[#allocation8 + $0x3a4] ss:$16 sps:$4 sm:$0xff]   ;;  %v4633_v19 = vld [vmem:[#allocation8 + $0x3a0] ss:$16 sps:$4 sm:$0xff]   ;;  %v4636_v24 = vld [vmem:[#allocation8 + $0x3a8] ss:$16 sps:$4 sm:$0xff]  }
 0x254   : > { %v1636_v4 = vmax.f32 %v1610_v25, %v1611_v0  ;;  %v1613_v38 = vmax.f32 %v1471_v29, %v1564_v33  ;;  %3156 = vmatprep.subr.bf16.mxu1 %v4608_v23  ;;  %v4641_v6 = vld [vmem:[#allocation8 + $0x3c4] ss:$16 sps:$4 sm:$0xff]   ;;  %v4644_v7 = vld [vmem:[#allocation8 + $0x3cc] ss:$16 sps:$4 sm:$0xff]   ;;  %v4639_v10 = vld [vmem:[#allocation8 + $0x3c0] ss:$16 sps:$4 sm:$0xff]  }
 0x255   : > { %v4642_v11 = vld [vmem:[#allocation8 + $0x3c8] ss:$16 sps:$4 sm:$0xff]   ;;  %v4647_v13 = vld [vmem:[#allocation8 + $0x3e4] ss:$16 sps:$4 sm:$0xff]   ;;  %v4650_v14 = vld [vmem:[#allocation8 + $0x3ec] ss:$16 sps:$4 sm:$0xff]  }
 0x256   : > { %v1637_v39 = vmax.f32 %v1612_v35, %v1613_v38  ;;  %2938 = vmatpush1.bf16.msra.mxu0 %v4603_v34  ;;  %v1659_v43 = vmax.f32 %v1636_v4, 0.0  ;;  %v4645_v16 = vld [vmem:[#allocation8 + $0x3e0] ss:$16 sps:$4 sm:$0xff]   ;;  %v4648_v61 = vld [vmem:[#allocation8 + $0x3e8] ss:$16 sps:$4 sm:$0xff]  }
 0x257   : > { %3157 = vmatpush1.bf16.msra.mxu1 %v4606_v36  ;;  %2939 = vmatprep.subr.bf16.mxu0 %v4611_v37  ;;  %v4653_v51 = vld [vmem:[#allocation8 + $0x404] ss:$16 sps:$4 sm:$0xff]   ;;  %v4656_v17 = vld [vmem:[#allocation8 + $0x40c] ss:$16 sps:$4 sm:$0xff]   ;;  %v4651_v20 = vld [vmem:[#allocation8 + $0x400] ss:$16 sps:$4 sm:$0xff]  }
 0x258   : > { %v1661_v62 = vmax.f32 %v1637_v39, 0.0  ;;  %3158 = vmatprep.subr.bf16.mxu1 %v4614_v5  ;;  %v4654_v21 = vld [vmem:[#allocation8 + $0x408] ss:$16 sps:$4 sm:$0xff]   ;;  %v4659_v22 = vld [vmem:[#allocation8 + $0x424] ss:$16 sps:$4 sm:$0xff]  }
 0x259   : > { %v4662_v23 = vld [vmem:[#allocation8 + $0x42c] ss:$16 sps:$4 sm:$0xff]   ;;  %v4657_v25 = vld [vmem:[#allocation8 + $0x420] ss:$16 sps:$4 sm:$0xff]   ;;  %v4660_v26 = vld [vmem:[#allocation8 + $0x428] ss:$16 sps:$4 sm:$0xff]  }
 0x25a   : > { %2940 = vmatpush1.bf16.msra.mxu0 %v4609_v40  ;;  %v5546_v48 = vpack.c.bf16 %v1661_v62, %v1659_v43  ;;  %v4665_v27 = vld [vmem:[#allocation8 + $0x444] ss:$16 sps:$4 sm:$0xff]   ;;  %v4668_v28 = vld [vmem:[#allocation8 + $0x44c] ss:$16 sps:$4 sm:$0xff]   ;;  %v4663_v30 = vld [vmem:[#allocation8 + $0x440] ss:$16 sps:$4 sm:$0xff]  }
 0x25b   : > { %3159 = vmatpush1.bf16.msra.mxu1 %v4612_v41  ;;  %2941 = vmatprep.subr.bf16.mxu0 %v4617_v60  ;;  %v4666_v0 = vld [vmem:[#allocation8 + $0x448] ss:$16 sps:$4 sm:$0xff]   ;;  %v4671_v29 = vld [vmem:[#allocation8 + $0x464] ss:$16 sps:$4 sm:$0xff]   ;;  %v4669_v33 = vld [vmem:[#allocation8 + $0x460] ss:$16 sps:$4 sm:$0xff]  }
 0x25c   : > { %3160 = vmatprep.subr.bf16.mxu1 %v4620_v45  ;;  %v4672_v34 = vld [vmem:[#allocation8 + $0x468] ss:$16 sps:$4 sm:$0xff]   ;;  %v4677_v35 = vld [vmem:[#allocation8 + $0x484] ss:$16 sps:$4 sm:$0xff]   ;;  %v4680_v36 = vld [vmem:[#allocation8 + $0x48c] ss:$16 sps:$4 sm:$0xff]  }
 0x25d   : > { %v4675_v37 = vld [vmem:[#allocation8 + $0x480] ss:$16 sps:$4 sm:$0xff]   ;;  %v4678_v4 = vld [vmem:[#allocation8 + $0x488] ss:$16 sps:$4 sm:$0xff]   ;;  %v4683_v38 = vld [vmem:[#allocation8 + $0x4a4] ss:$16 sps:$4 sm:$0xff]  }
 0x25e   : > { %2942 = vmatpush1.bf16.msra.mxu0 %v4615_v47  ;;  %v4686_v5 = vld [vmem:[#allocation8 + $0x4ac] ss:$16 sps:$4 sm:$0xff]   ;;  %v4681_v39 = vld [vmem:[#allocation8 + $0x4a0] ss:$16 sps:$4 sm:$0xff]   ;;  %v4684_v40 = vld [vmem:[#allocation8 + $0x4a8] ss:$16 sps:$4 sm:$0xff]  }
 0x25f   : > { %3161 = vmatpush1.bf16.msra.mxu1 %v4618_v52  ;;  %2943 = vmatprep.subr.bf16.mxu0 %v4623_v53  ;;  %v4689_v41 = vld [vmem:[#allocation8 + $0x4c4] ss:$16 sps:$4 sm:$0xff]   ;;  %v4692_v60 = vld [vmem:[#allocation8 + $0x4cc] ss:$16 sps:$4 sm:$0xff]   ;;  %v4687_v43 = vld [vmem:[#allocation8 + $0x4c0] ss:$16 sps:$4 sm:$0xff]  }
 0x260   : > { %3162 = vmatprep.subr.bf16.mxu1 %v4626_v54  ;;  %v4690_v62 = vld [vmem:[#allocation8 + $0x4c8] ss:$16 sps:$4 sm:$0xff]   ;;  %v4695_v45 = vld [vmem:[#allocation8 + $0x4e4] ss:$16 sps:$4 sm:$0xff]   ;;  %v4698_v47 = vld [vmem:[#allocation8 + $0x4ec] ss:$16 sps:$4 sm:$0xff]  }
 0x261   : > { %v4693_v52 = vld [vmem:[#allocation8 + $0x4e0] ss:$16 sps:$4 sm:$0xff]   ;;  %v4696_v53 = vld [vmem:[#allocation8 + $0x4e8] ss:$16 sps:$4 sm:$0xff]   ;;  %v4701_v54 = vld [vmem:[#allocation8 + $0x504] ss:$16 sps:$4 sm:$0xff]  }
 0x262   : > { %2944 = vmatpush1.bf16.msra.mxu0 %v4621_v55  ;;  %v4704_v55 = vld [vmem:[#allocation8 + $0x50c] ss:$16 sps:$4 sm:$0xff]  }
 0x263   : > { %3163 = vmatpush1.bf16.msra.mxu1 %v4624_v56  ;;  %2945 = vmatprep.subr.bf16.mxu0 %v4629_v2  ;;  %v4699_v56 = vld [vmem:[#allocation8 + $0x500] ss:$16 sps:$4 sm:$0xff]   ;;  %v4702_v2 = vld [vmem:[#allocation8 + $0x508] ss:$16 sps:$4 sm:$0xff]  }
 0x264   : > { %3164 = vmatprep.subr.bf16.mxu1 %v4632_v57  ;;  %v4707_v57 = vld [vmem:[#allocation8 + $0x524] ss:$16 sps:$4 sm:$0xff]  }
 0x266   : > { %2946 = vmatpush1.bf16.msra.mxu0 %v4627_v3  ;;  %v4710_v3 = vld [vmem:[#allocation8 + $0x52c] ss:$16 sps:$4 sm:$0xff]  }
 0x267   : > { %3165 = vmatpush1.bf16.msra.mxu1 %v4630_v58  ;;  %2947 = vmatprep.subr.bf16.mxu0 %v4635_v9  ;;  %v4705_v58 = vld [vmem:[#allocation8 + $0x520] ss:$16 sps:$4 sm:$0xff]   ;;  %v4713_v9 = vld [vmem:[#allocation8 + $0x544] ss:$16 sps:$4 sm:$0xff]  }
 0x268   : > { %3166 = vmatprep.subr.bf16.mxu1 %v4638_v12  ;;  %v4716_v12 = vld [vmem:[#allocation8 + $0x54c] ss:$16 sps:$4 sm:$0xff]  }
 0x26a   : > { %2948 = vmatpush1.bf16.msra.mxu0 %v4633_v19  ;;  %v4711_v19 = vld [vmem:[#allocation8 + $0x540] ss:$16 sps:$4 sm:$0xff]  }
 0x26b   : > { %3167 = vmatpush1.bf16.msra.mxu1 %v4636_v24  ;;  %2949 = vmatprep.subr.bf16.mxu0 %v4641_v6  ;;  %v4714_v24 = vld [vmem:[#allocation8 + $0x548] ss:$16 sps:$4 sm:$0xff]   ;;  %v4719_v6 = vld [vmem:[#allocation8 + $0x564] ss:$16 sps:$4 sm:$0xff]  }
 0x26c   : > { %3168 = vmatprep.subr.bf16.mxu1 %v4644_v7  ;;  %v4722_v7 = vld [vmem:[#allocation8 + $0x56c] ss:$16 sps:$4 sm:$0xff]  }
 0x26e   : > { %2950 = vmatpush1.bf16.msra.mxu0 %v4639_v10  ;;  %v4717_v10 = vld [vmem:[#allocation8 + $0x560] ss:$16 sps:$4 sm:$0xff]  }
 0x26f   : > { %3169 = vmatpush1.bf16.msra.mxu1 %v4642_v11  ;;  %2951 = vmatprep.subr.bf16.mxu0 %v4647_v13  ;;  %v4720_v11 = vld [vmem:[#allocation8 + $0x568] ss:$16 sps:$4 sm:$0xff]   ;;  %v4725_v13 = vld [vmem:[#allocation8 + $0x584] ss:$16 sps:$4 sm:$0xff]  }
 0x270   : > { %3170 = vmatprep.subr.bf16.mxu1 %v4650_v14  ;;  %v4728_v14 = vld [vmem:[#allocation8 + $0x58c] ss:$16 sps:$4 sm:$0xff]  }
 0x272   : > { %2952 = vmatpush1.bf16.msra.mxu0 %v4645_v16  ;;  %v4723_v16 = vld [vmem:[#allocation8 + $0x580] ss:$16 sps:$4 sm:$0xff]  }
 0x273   : > { %3171 = vmatpush1.bf16.msra.mxu1 %v4648_v61  ;;  %2994 = vmatprep.subr.bf16.mxu0 %v4653_v51  ;;  %v4726_v61 = vld [vmem:[#allocation8 + $0x588] ss:$16 sps:$4 sm:$0xff]   ;;  %v4731_v51 = vld [vmem:[#allocation8 + $0x5a4] ss:$16 sps:$4 sm:$0xff]  }
 0x274   : > { %3213 = vmatprep.subr.bf16.mxu1 %v4656_v17  ;;  %v4734_v17 = vld [vmem:[#allocation8 + $0x5ac] ss:$16 sps:$4 sm:$0xff]  }
 0x275   : > { %2954 = vmatmul.mubr.bf16.vlgmr.msra.gmra.mrb[48].mxu0 %v5422_v18 }
 0x276   : > { %3173 = vmatmul.mubr.bf16.vlgmr.msra.gmra.mrb[48].mxu1 %v5422_v18  ;;  %2963 = vmatprep.mubr.bf16.mxu0 %v5512_v8  ;;  %v4674_v18 = vld [vmem:[#allocation8 + $0x46c] ss:$16 sps:$4 sm:$0xff]  }
 0x277   : > { %2995 = vmatpush1.bf16.msra.mxu0 %v4651_v20  ;;  %3182 = vmatprep.mubr.bf16.mxu1 %v5512_v8  ;;  %v4729_v20 = vld [vmem:[#allocation8 + $0x5a0] ss:$16 sps:$4 sm:$0xff]  }
 0x278   : > { %3214 = vmatpush1.bf16.msra.mxu1 %v4654_v21  ;;  %2996 = vmatprep.subr.bf16.mxu0 %v4659_v22  ;;  %v4732_v21 = vld [vmem:[#allocation8 + $0x5a8] ss:$16 sps:$4 sm:$0xff]   ;;  %v4737_v22 = vld [vmem:[#allocation8 + $0x5c4] ss:$16 sps:$4 sm:$0xff]  }
 0x279   : > { %3215 = vmatprep.subr.bf16.mxu1 %v4662_v23  ;;  %v4740_v23 = vld [vmem:[#allocation8 + $0x5cc] ss:$16 sps:$4 sm:$0xff]  }
 0x27b   : > { %2997 = vmatpush1.bf16.msra.mxu0 %v4657_v25  ;;  %v4735_v25 = vld [vmem:[#allocation8 + $0x5c0] ss:$16 sps:$4 sm:$0xff]  }
 0x27c   : > { %3216 = vmatpush1.bf16.msra.mxu1 %v4660_v26  ;;  %2998 = vmatprep.subr.bf16.mxu0 %v4665_v27  ;;  %v4738_v26 = vld [vmem:[#allocation8 + $0x5c8] ss:$16 sps:$4 sm:$0xff]   ;;  %v4743_v27 = vld [vmem:[#allocation8 + $0x5e4] ss:$16 sps:$4 sm:$0xff]  }
 0x27d   : > { %2964 = vmatmul.mubr.bf16.gmra.mrb[52].mxu0 %v5432_v46  ;;  %3217 = vmatprep.subr.bf16.mxu1 %v4668_v28  ;;  %v4746_v28 = vld [vmem:[#allocation8 + $0x5ec] ss:$16 sps:$4 sm:$0xff]  }
 0x27e   : > { %3183 = vmatmul.mubr.bf16.gmra.mrb[52].mxu1 %v5432_v46  ;;  %2973 = vmatprep.mubr.bf16.mxu0 %v5526_v50 }
 0x27f   : > { %2999 = vmatpush1.bf16.msra.mxu0 %v4663_v30  ;;  %3192 = vmatprep.mubr.bf16.mxu1 %v5526_v50  ;;  %v4741_v30 = vld [vmem:[#allocation8 + $0x5e0] ss:$16 sps:$4 sm:$0xff]  }
 0x280   : > { %3218 = vmatpush1.bf16.msra.mxu1 %v4666_v0  ;;  %3000 = vmatprep.subr.bf16.mxu0 %v4671_v29  ;;  %v4744_v0 = vld [vmem:[#allocation8 + $0x5e8] ss:$16 sps:$4 sm:$0xff]   ;;  %v4747_v29 = vld [vmem:[#allocation10 + $0x40] sm:$0xff]  }
 0x281   : > { %3219 = vmatprep.subr.bf16.mxu1 %v4674_v18  ;;  %v4748_v18 = vld [vmem:[#allocation10] sm:$0xff]  }
 0x283   : > { %3001 = vmatpush1.bf16.msra.mxu0 %v4669_v33  ;;  %v4749_v33 = vld [vmem:[#allocation10 + $0x48] sm:$0xff]  }
 0x284   : > { %3220 = vmatpush1.bf16.msra.mxu1 %v4672_v34  ;;  %3002 = vmatprep.subr.bf16.mxu0 %v4677_v35  ;;  %v4750_v34 = vld [vmem:[#allocation10 + $0x8] sm:$0xff]   ;;  %v4751_v35 = vld [vmem:[#allocation10 + $0x50] sm:$0xff]  }
 0x285   : > { %2974 = vmatmul.mubr.bf16.gmra.mrb[56].mxu0 %v5442_v15  ;;  %3221 = vmatprep.subr.bf16.mxu1 %v4680_v36  ;;  %v4755_v36 = vld [vmem:[#allocation10 + $0xc0] sm:$0xff]  }
 0x286   : > { %3193 = vmatmul.mubr.bf16.gmra.mrb[56].mxu1 %v5442_v15  ;;  %2983 = vmatprep.mubr.bf16.mxu0 %v5542_v32 }
 0x287   : > { %3003 = vmatpush1.bf16.msra.mxu0 %v4675_v37  ;;  %3202 = vmatprep.mubr.bf16.mxu1 %v5542_v32  ;;  %v4757_v37 = vld [vmem:[#allocation10 + $0x80] sm:$0xff]  }
 0x288   : > { %3222 = vmatpush1.bf16.msra.mxu1 %v4678_v4  ;;  %3004 = vmatprep.subr.bf16.mxu0 %v4683_v38  ;;  %v4758_v4 = vld [vmem:[#allocation10 + $0x20] sm:$0xff]   ;;  %v4761_v38 = vld [vmem:[#allocation10 + $0x88] sm:$0xff]  }
 0x289   : > { %3223 = vmatprep.subr.bf16.mxu1 %v4686_v5  ;;  %v4762_v5 = vld [vmem:[#allocation10 + $0x28] sm:$0xff]  }
 0x28b   : > { %3005 = vmatpush1.bf16.msra.mxu0 %v4681_v39  ;;  %v4764_v39 = vld [vmem:[#allocation10 + $0x70] sm:$0xff]  }
 0x28c   : > { %3224 = vmatpush1.bf16.msra.mxu1 %v4684_v40  ;;  %3006 = vmatprep.subr.bf16.mxu0 %v4689_v41  ;;  %v4765_v40 = vld [vmem:[#allocation10 + $0x90] sm:$0xff]  }
 0x28d   : > { %2984 = vmatmul.mubr.bf16.gmra.mrb[60].mxu0 %v5452_v44  ;;  %3225 = vmatprep.subr.bf16.mxu1 %v4692_v60  ;;  %v4766_v41 = vld [vmem:[#allocation10 + $0x30] sm:$0xff]   ;;  %v4767_v60 = vld [vmem:[#allocation10 + $0xd8] sm:$0xff]  }
 0x28e   : > { %3203 = vmatmul.mubr.bf16.gmra.mrb[60].mxu1 %v5452_v44  ;;  %3026 = vmatprep.mubr.bf16.mxu0 %v5512_v8 }
 0x28f   : > { %3007 = vmatpush1.bf16.msra.mxu0 %v4687_v43  ;;  %3245 = vmatprep.mubr.bf16.mxu1 %v5512_v8  ;;  %v4708_v8 = vld [vmem:[#allocation8 + $0x528] ss:$16 sps:$4 sm:$0xff]  }
 0x290   : > { %3226 = vmatpush1.bf16.msra.mxu1 %v4690_v62  ;;  %3008 = vmatprep.subr.bf16.mxu0 %v4695_v45  ;;  %v4768_v43 = vld [vmem:[#allocation10 + $0x78] sm:$0xff]  }
 0x291   : > { %3227 = vmatprep.subr.bf16.mxu1 %v4698_v47  ;;  %v4769_v62 = vld [vmem:[#allocation10 + $0x98] sm:$0xff]   ;;  %v4771_v47 = vld [vmem:[#allocation10 + $0xe0] sm:$0xff]  }
 0x292   : > { %v4770_v45 = vld [vmem:[#allocation10 + $0x38] sm:$0xff]  }
 0x293   : > { %3009 = vmatpush1.bf16.msra.mxu0 %v4693_v52  ;;  %v4772_v52 = vld [vmem:[#allocation10 + $0xa0] sm:$0xff]  }
 0x294   : > { %3228 = vmatpush1.bf16.msra.mxu1 %v4696_v53  ;;  %3010 = vmatprep.subr.bf16.mxu0 %v4701_v54  ;;  %v4773_v53 = vld [vmem:[#allocation10 + $0xe8] sm:$0xff]  }
 0x295   : > { %3229 = vmatprep.subr.bf16.mxu1 %v4704_v55  ;;  %v4774_v54 = vld [vmem:[#allocation10 + $0xa8] sm:$0xff]   ;;  %v4775_v55 = vld [vmem:[#allocation10 + $0xf0] sm:$0xff]  }
 0x297   : > { %3011 = vmatpush1.bf16.msra.mxu0 %v4699_v56  ;;  %v4776_v56 = vld [vmem:[#allocation10 + $0xb0] sm:$0xff]  }
 0x298   : > { %3230 = vmatpush1.bf16.msra.mxu1 %v4702_v2  ;;  %3012 = vmatprep.subr.bf16.mxu0 %v4707_v57  ;;  %v4777_v2 = vld [vmem:[#allocation10 + $0xf8] sm:$0xff]  }
 0x299   : > { %3231 = vmatprep.subr.bf16.mxu1 %v4710_v3  ;;  %v4778_v57 = vld [vmem:[#allocation10 + $0xb8] sm:$0xff]   ;;  %v1866_v3 = vld [vmem:[%s5687_s4] sm:$0xf] }
 0x29b   : > { %3013 = vmatpush1.bf16.msra.mxu0 %v4705_v58  ;;  %v5583_v58 = vrot.slane %v1866_v3, %v583_v42 }
 0x29c   : > { %3232 = vmatpush1.bf16.msra.mxu1 %v4708_v8  ;;  %3014 = vmatprep.subr.bf16.mxu0 %v4713_v9  ;;  %v5587_v8 = vrot.slane %v1866_v3, %v591_v49  ;;  %v5591_v9 = vrot.slane %v1866_v3, %v587_v63 }
 0x29d   : > { %3233 = vmatprep.subr.bf16.mxu1 %v4716_v12  ;;  %v5595_v12 = vrot.slane %v1866_v3, %v595_v1 }
 0x29f   : > { %3015 = vmatpush1.bf16.msra.mxu0 %v4711_v19 }
 0x2a0   : > { %3234 = vmatpush1.bf16.msra.mxu1 %v4714_v24  ;;  %3016 = vmatprep.subr.bf16.mxu0 %v4719_v6 }
 0x2a1   : > { %3235 = vmatprep.subr.bf16.mxu1 %v4722_v7 }
 0x2a3   : > { %3017 = vmatpush1.bf16.msra.mxu0 %v4717_v10 }
 0x2a4   : > { %3236 = vmatpush1.bf16.msra.mxu1 %v4720_v11  ;;  %3018 = vmatprep.subr.bf16.mxu0 %v4725_v13 }
 0x2a5   : > { %3237 = vmatprep.subr.bf16.mxu1 %v4728_v14 }
 0x2a7   : > { %3019 = vmatpush1.bf16.msra.mxu0 %v4723_v16 }
 0x2a8   : > { %3238 = vmatpush1.bf16.msra.mxu1 %v4726_v61  ;;  %3020 = vmatprep.subr.bf16.mxu0 %v4731_v51 }
 0x2a9   : > { %3239 = vmatprep.subr.bf16.mxu1 %v4734_v17 }
 0x2ab   : > { %3021 = vmatpush1.bf16.msra.mxu0 %v4729_v20 }
 0x2ac   : > { %3240 = vmatpush1.bf16.msra.mxu1 %v4732_v21  ;;  %3022 = vmatprep.subr.bf16.mxu0 %v4737_v22 }
 0x2ad   : > { %3241 = vmatprep.subr.bf16.mxu1 %v4740_v23 }
 0x2af   : > { %3023 = vmatpush1.bf16.msra.mxu0 %v4735_v25 }
 0x2b0   : > { %3242 = vmatpush1.bf16.msra.mxu1 %v4738_v26  ;;  %3024 = vmatprep.subr.bf16.mxu0 %v4743_v27 }
 0x2b1   : > { %3243 = vmatprep.subr.bf16.mxu1 %v4746_v28 }
 0x2b3   : > { %3025 = vmatpush1.bf16.msra.mxu0 %v4741_v30 }
 0x2b4   : > { %3244 = vmatpush1.bf16.msra.mxu1 %v4744_v0  ;;  %4206 = vmatprep.subr.bf16.mxu0 %v4747_v29 }
 0x2b5   : > { %4228 = vmatprep.subr.bf16.mxu1 %v4755_v36 }
 0x2b6   : > { %3027 = vmatmul.mubr.bf16.vlgmr.msra.gmra.mrb[48].mxu0 %v5432_v46 }
 0x2b7   : > { %3246 = vmatmul.mubr.bf16.vlgmr.msra.gmra.mrb[48].mxu1 %v5432_v46  ;;  %3036 = vmatprep.mubr.bf16.mxu0 %v5526_v50  ;;  %v4752_v46 = vld [vmem:[#allocation10 + $0x10] sm:$0xff]  }
 0x2b8   : > { %3255 = vmatprep.mubr.bf16.mxu1 %v5526_v50  ;;  %4207 = vmatpush3.bf16.msra.mxu0 %v4748_v18  ;;  %v4753_v50 = vld [vmem:[#allocation10 + $0x58] sm:$0xff]  }
 0x2b9   : > { %4208 = vmatprep.subr.bf16.mxu0 %v4749_v33  ;;  %4229 = vmatpush3.bf16.msra.mxu1 %v4757_v37 }
 0x2bc   : > { %4209 = vmatpush3.bf16.msra.mxu0 %v4750_v34 }
 0x2bd   : > { %4210 = vmatprep.subr.bf16.mxu0 %v4751_v35 }
 0x2be   : > { %3037 = vmatmul.mubr.bf16.gmra.mrb[52].mxu0 %v5442_v15 }
 0x2bf   : > { %3256 = vmatmul.mubr.bf16.gmra.mrb[52].mxu1 %v5442_v15  ;;  %3046 = vmatprep.mubr.bf16.mxu0 %v5542_v32  ;;  %v4754_v15 = vld [vmem:[#allocation10 + $0x18] sm:$0xff]  }
 0x2c0   : > { %3265 = vmatprep.mubr.bf16.mxu1 %v5542_v32  ;;  %4211 = vmatpush3.bf16.msra.mxu0 %v4752_v46  ;;  %v4756_v32 = vld [vmem:[#allocation10 + $0x60] sm:$0xff]  }
 0x2c1   : > { %4212 = vmatprep.subr.bf16.mxu0 %v4753_v50 }
 0x2c4   : > { %4213 = vmatpush3.bf16.msra.mxu0 %v4754_v15 }
 0x2c5   : > { %4214 = vmatprep.subr.bf16.mxu0 %v4756_v32 }
 0x2c6   : > { %3047 = vmatmul.mubr.bf16.gmra.mrb[56].mxu0 %v5452_v44 }
 0x2c7   : > { %3266 = vmatmul.mubr.bf16.gmra.mrb[56].mxu1 %v5452_v44  ;;  %3056 = vmatprep.mubr.bf16.mxu0 %v5546_v48  ;;  %v4759_v44 = vld [vmem:[#allocation10 + $0xc8] sm:$0xff]  }
 0x2c8   : > { %3275 = vmatprep.mubr.bf16.mxu1 %v5546_v48  ;;  %4215 = vmatpush3.bf16.msra.mxu0 %v4758_v4  ;;  %v4760_v48 = vld [vmem:[#allocation10 + $0x68] sm:$0xff]  }
 0x2c9   : > { %4230 = vmatprep.subr.bf16.mxu1 %v4759_v44  ;;  %4216 = vmatprep.subr.bf16.mxu0 %v4760_v48 }
 0x2ca   : > { %4231 = vmatpush3.bf16.msra.mxu1 %v4761_v38 }
 0x2cc   : > { %4217 = vmatpush3.bf16.msra.mxu0 %v4762_v5 }
 0x2cd   : > { %4218 = vmatprep.subr.bf16.mxu0 %v4764_v39 }
 0x2ce   : > { %3057 = vmatmul.mubr.bf16.gmra.mrb[60].mxu0 %v5460_v59 }
 0x2cf   : > { %3276 = vmatmul.mubr.bf16.gmra.mrb[60].mxu1 %v5460_v59  ;;  %v4763_v59 = vld [vmem:[#allocation10 + $0xd0] sm:$0xff]  }
 0x2d0   : > { %4232 = vmatprep.subr.bf16.mxu1 %v4763_v59  ;;  %4219 = vmatpush3.bf16.msra.mxu0 %v4766_v41 }
 0x2d1   : > { %4233 = vmatpush3.bf16.msra.mxu1 %v4765_v40  ;;  %4220 = vmatprep.subr.bf16.mxu0 %v4768_v43 }
 0x2d2   : > { %4234 = vmatprep.subr.bf16.mxu1 %v4767_v60 }
 0x2d4   : > { %4221 = vmatpush3.bf16.msra.mxu0 %v4770_v45 }
 0x2d5   : > { %4235 = vmatpush3.bf16.msra.mxu1 %v4769_v62 }
 0x2d6   : > { %4236 = vmatprep.subr.bf16.mxu1 %v4771_v47 }
 0x2d9   : > { %4237 = vmatpush3.bf16.msra.mxu1 %v4772_v52 }
 0x2da   : > { %4238 = vmatprep.subr.bf16.mxu1 %v4773_v53 }
 0x2dd   : > { %4239 = vmatpush3.bf16.msra.mxu1 %v4774_v54 }
 0x2de   : > { %4240 = vmatprep.subr.bf16.mxu1 %v4775_v55 }
 0x2e1   : > { %4241 = vmatpush3.bf16.msra.mxu1 %v4776_v56 }
 0x2e2   : > { %4242 = vmatprep.subr.bf16.mxu1 %v4777_v2 }
 0x2e5   : > { %4243 = vmatpush3.bf16.msra.mxu1 %v4778_v57 }
 0x389   : > { %v3028_v19 = vpop.f32.mrb[48].mxu0 }
 0x38a   : > { %v4250_v24 = vadd.f32 %v3028_v19, %v5583_v58  ;;  %v3247_v6 = vpop.f32.mrb[48].mxu1  ;;  %v3030_v7 = vpop.f32.mrb[49].mxu0 }
 0x38b   : > { %v4266_v42 = vadd.f32 %v3247_v6, %v5587_v8  ;;  %v4251_v10 = vadd.f32 %v3030_v7, %v5591_v9  ;;  %v3249_v11 = vpop.f32.mrb[49].mxu1  ;;  %v3032_v49 = vpop.f32.mrb[50].mxu0 }
 0x38c   : > { %v4267_v13 = vadd.f32 %v3249_v11, %v5595_v12  ;;  %v4252_v63 = vadd.f32 %v3032_v49, %v5583_v58  ;;  %v3251_v14 = vpop.f32.mrb[50].mxu1  ;;  %v3034_v16 = vpop.f32.mrb[51].mxu0 }
 0x38d   : > { %v3286_v31 = vmax.f32 %v4250_v24, %v4266_v42  ;;  %v4268_v1 = vadd.f32 %v3251_v14, %v5587_v8  ;;  %v4253_v61 = vadd.f32 %v3034_v16, %v5591_v9  ;;  %v3253_v51 = vpop.f32.mrb[51].mxu1 }
 0x38e   : > { %v3287_v17 = vmax.f32 %v4251_v10, %v4267_v13  ;;  %v4269_v20 = vadd.f32 %v3253_v51, %v5595_v12 }
 0x38f   : > { %v3288_v21 = vmax.f32 %v4252_v63, %v4268_v1 }
 0x390   : > { %v3302_v22 = vmax.f32 %v3286_v31, %v3287_v17  ;;  %v3289_v23 = vmax.f32 %v4253_v61, %v4269_v20 }
 0x391   : > { %v3038_v25 = vpop.f32.mrb[52].mxu0 }
 0x392   : > { %v3303_v26 = vmax.f32 %v3288_v21, %v3289_v23  ;;  %v4254_v27 = vadd.f32 %v3038_v25, %v5583_v58  ;;  %v3257_v28 = vpop.f32.mrb[52].mxu1  ;;  %v3040_v30 = vpop.f32.mrb[53].mxu0  ;;  %v3310_v34 = vmax.f32 %v3302_v22, 0.0 }
 0x393   : > { %v4270_v0 = vadd.f32 %v3257_v28, %v5587_v8  ;;  %v4255_v29 = vadd.f32 %v3040_v30, %v5591_v9  ;;  %v3259_v18 = vpop.f32.mrb[53].mxu1  ;;  %v3042_v33 = vpop.f32.mrb[54].mxu0 }
 0x394   : > { %v3311_v35 = vmax.f32 %v3303_v26, 0.0  ;;  %v4271_v46 = vadd.f32 %v3259_v18, %v5595_v12  ;;  %v4256_v50 = vadd.f32 %v3042_v33, %v5583_v58  ;;  %v3261_v15 = vpop.f32.mrb[54].mxu1  ;;  %v3044_v36 = vpop.f32.mrb[55].mxu0 }
 0x395   : > { %v3290_v32 = vmax.f32 %v4254_v27, %v4270_v0  ;;  %v4272_v37 = vadd.f32 %v3261_v15, %v5587_v8  ;;  %v4257_v4 = vadd.f32 %v3044_v36, %v5591_v9  ;;  %v3263_v44 = vpop.f32.mrb[55].mxu1 }
 0x396   : > { %v3318_v48 = vpack.c.bf16 %v3311_v35, %v3310_v34  ;;  %v3291_v38 = vmax.f32 %v4255_v29, %v4271_v46  ;;  %v4273_v5 = vadd.f32 %v3263_v44, %v5595_v12 }
 0x397   : > { %v3292_v59 = vmax.f32 %v4256_v50, %v4272_v37 }
 0x398   : > { %v3304_v39 = vmax.f32 %v3290_v32, %v3291_v38  ;;  %v3293_v40 = vmax.f32 %v4257_v4, %v4273_v5 }
 0x399   : > { %v3048_v41 = vpop.f32.mrb[56].mxu0 }
 0x39a   : > { %v3305_v60 = vmax.f32 %v3292_v59, %v3293_v40  ;;  %v4258_v43 = vadd.f32 %v3048_v41, %v5583_v58  ;;  %v3267_v62 = vpop.f32.mrb[56].mxu1  ;;  %v3050_v45 = vpop.f32.mrb[57].mxu0  ;;  %v3312_v55 = vmax.f32 %v3304_v39, 0.0  ;;  %v4166_v59 = vld [vmem:[%s5689_s6] ss:$0 sm:$0xff] }
 0x39b   : > { %v4274_v47 = vadd.f32 %v3267_v62, %v5587_v8  ;;  %v4259_v52 = vadd.f32 %v3050_v45, %v5591_v9  ;;  %v3269_v53 = vpop.f32.mrb[57].mxu1  ;;  %v3052_v54 = vpop.f32.mrb[58].mxu0 }
 0x39c   : > { %v3313_v56 = vmax.f32 %v3305_v60, 0.0  ;;  %v4275_v2 = vadd.f32 %v3269_v53, %v5595_v12  ;;  %v4260_v57 = vadd.f32 %v3052_v54, %v5583_v58  ;;  %v3271_v3 = vpop.f32.mrb[58].mxu1  ;;  %v3054_v19 = vpop.f32.mrb[59].mxu0 }
 0x39d   : > { %v3294_v24 = vmax.f32 %v4258_v43, %v4274_v47  ;;  %v4276_v6 = vadd.f32 %v3271_v3, %v5587_v8  ;;  %v4261_v7 = vadd.f32 %v3054_v19, %v5591_v9  ;;  %v3273_v42 = vpop.f32.mrb[59].mxu1 }
 0x39e   : > { %v3295_v10 = vmax.f32 %v4259_v52, %v4275_v2  ;;  %v4277_v11 = vadd.f32 %v3273_v42, %v5595_v12  ;;  %v3319_v49 = vpack.c.bf16 %v3313_v56, %v3312_v55 }
 0x39f   : > { %v3296_v13 = vmax.f32 %v4260_v57, %v4276_v6 }
 0x3a0   : > { %v3306_v63 = vmax.f32 %v3294_v24, %v3295_v10  ;;  %v3297_v14 = vmax.f32 %v4261_v7, %v4277_v11  ;;  %3617 = vmatprep.mubr.bf16.mxu0 %v3319_v49 }
 0x3a1   : > { %3618 = vmatmul.mubr.bf16.vlgmr.msra.gmra.mrb[64].mxu0 %v3318_v48  ;;  %v3058_v16 = vpop.f32.mrb[60].mxu0 }
 0x3a2   : > { %v3307_v31 = vmax.f32 %v3296_v13, %v3297_v14  ;;  %v4262_v1 = vadd.f32 %v3058_v16, %v5583_v58  ;;  %v3277_v61 = vpop.f32.mrb[60].mxu1  ;;  %v3060_v51 = vpop.f32.mrb[61].mxu0  ;;  %v3314_v23 = vmax.f32 %v3306_v63, 0.0 }
 0x3a3   : > { %v4278_v17 = vadd.f32 %v3277_v61, %v5587_v8  ;;  %v4263_v20 = vadd.f32 %v3060_v51, %v5591_v9  ;;  %v3279_v21 = vpop.f32.mrb[61].mxu1  ;;  %v3062_v22 = vpop.f32.mrb[62].mxu0 }
 0x3a4   : > { %v3315_v25 = vmax.f32 %v3307_v31, 0.0  ;;  %v4279_v26 = vadd.f32 %v3279_v21, %v5595_v12  ;;  %v4264_v27 = vadd.f32 %v3062_v22, %v5583_v58  ;;  %v3281_v28 = vpop.f32.mrb[62].mxu1  ;;  %v3064_v30 = vpop.f32.mrb[63].mxu0 }
 0x3a5   : > { %v3298_v0 = vmax.f32 %v4262_v1, %v4278_v17  ;;  %v4280_v29 = vadd.f32 %v3281_v28, %v5587_v8  ;;  %v4265_v18 = vadd.f32 %v3064_v30, %v5591_v9  ;;  %v3283_v33 = vpop.f32.mrb[63].mxu1 }
 0x3a6   : > { %v3320_v34 = vpack.c.bf16 %v3315_v25, %v3314_v23  ;;  %v3299_v35 = vmax.f32 %v4263_v20, %v4279_v26  ;;  %v4281_v46 = vadd.f32 %v3283_v33, %v5595_v12 }
 0x3a7   : > { %v3300_v50 = vmax.f32 %v4264_v27, %v4280_v29 }
 0x3a8   : > { %v3308_v15 = vmax.f32 %v3298_v0, %v3299_v35  ;;  %v3301_v36 = vmax.f32 %v4265_v18, %v4281_v46 }
 0x3aa   : > { %v3309_v32 = vmax.f32 %v3300_v50, %v3301_v36  ;;  %v3316_v37 = vmax.f32 %v3308_v15, 0.0 }
 0x3ac   : > { %v3317_v4 = vmax.f32 %v3309_v32, 0.0 }
 0x3ae   : > { %v3321_v44 = vpack.c.bf16 %v3317_v4, %v3316_v37 }
 0x3b0   : > { %3658 = vmatprep.mubr.bf16.mxu1 %v3321_v44 }
 0x3b1   : > { %3659 = vmatmul.mubr.bf16.vlgmr.msra.gmra.mrb[64].mxu1 %v3320_v34 }
 0x474   : > { %v4222_v58 = vpop.f32.mrb[64].mxu0 }
 0x475   : > { %v4223_v48 = vpop.f32.mrb[65].mxu0 }
 0x476   : > { %v4224_v38 = vadd.f32 %v4223_v48, %v4222_v58  ;;  %v4225_v8 = vpop.f32.mrb[66].mxu0 }
 0x477   : > { %v4226_v5 = vpop.f32.mrb[67].mxu0 }
 0x478   : > { %v4227_v9 = vadd.f32 %v4226_v5, %v4225_v8  ;;  %v3620_v40 = vadd.f32 %v4224_v38, %v4166_v59 }
 0x47a   : > { %v3623_v62 = vadd.f32 %v4227_v9, %v4166_v59 }
 0x484   : > { %v4244_v12 = vpop.f32.mrb[64].mxu1 }
 0x485   : > { %v4245_v39 = vpop.f32.mrb[65].mxu1 }
 0x486   : > { %v4246_v41 = vadd.f32 %v4245_v39, %v4244_v12  ;;  %v4247_v60 = vpop.f32.mrb[66].mxu1 }
 0x487   : > { %v4248_v43 = vpop.f32.mrb[67].mxu1 }
 0x488   : > { %v4249_v45 = vadd.f32 %v4248_v43, %v4247_v60  ;;  %v3661_v47 = vadd.f32 %v4246_v41, %v3620_v40 }
 0x48a   : > { %3667 = vmax.xlane.f32.xlu0 %v3661_v47  ;;  %v3664_v52 = vadd.f32 %v4249_v45, %v3623_v62 }
 0x48c   : > { %3669 = vmax.xlane.f32.xlu1 %v3664_v52 }
 0x517   : > { %v3668_v53 = vpop.xlane.xlu0 %3667 }
 0x518   : > { %v3671_v54 = vsub.f32 %v3661_v47, %v3668_v53 }
 0x519   : > { %v3670_v55 = vpop.xlane.xlu1 %3669 }
 0x51a   : > { %v3673_v56 = vmul.f32 1.442695, %v3671_v54  ;;  %v3672_v2 = vsub.f32 %v3664_v52, %v3670_v55 }
 0x51c   : > { %4779 = vpow2.f32 %v3673_v56  ;;  %v3675_v57 = vmul.f32 1.442695, %v3672_v2 }
 0x51e   : > { %4781 = vpow2.f32 %v3675_v57 }
 0x526   : > { %v4780_v3 = vpop.eup %4779 }
 0x527   : > { %3677 = vadd.xlane.f32.xlu0 %v4780_v3 }
 0x528   : > { %v4782_v19 = vpop.eup %4781 }
 0x52b   : > { %3679 = vadd.xlane.f32.xlu0 %v4782_v19 }
 0x5b4   : > { %v3678_v24 = vpop.xlane.xlu0 %3677 }
 0x5b5   : > { %4783 = vlog2.f32 %v3678_v24 }
 0x5b8   : > { %v3680_v6 = vpop.xlane.xlu0 %3679 }
 0x5b9   : > { %4785 = vlog2.f32 %v3680_v6 }
 0x5bf   : > { %v4784_v7 = vpop.eup %4783 }
 0x5c0   : > { %v3682_v42 = vmul.f32 0.6931472, %v4784_v7 }
 0x5c2   : > { %v3685_v10 = vsub.f32 %v3671_v54, %v3682_v42 }
 0x5c3   : > { %v4786_v11 = vpop.eup %4785 }
 0x5c4   : > { %3687 = vst [vmem:[%s377_s10] sm:$0xff] %v3685_v10  ;;  %v3684_v49 = vmul.f32 0.6931472, %v4786_v11 }
 0x5c6   : > { %v3686_v13 = vsub.f32 %v3672_v2, %v3684_v49 }
 0x5c8   : > { %3688 = vst [vmem:[%s377_s10 + $0x8] sm:$0xff] %v3686_v13 }
 0x5c9   : > { %4916 = shalt.err (!%p4913_p2)
}
 0x5ca   : > { %s4917_s23 = scalar_lea.hbm %s5639_s19, 256  ;;  %s4921_s12 = scalar_lea.hbm %s5726_s29, 512 }
 0x5cb   : > { %p4918_p6 = scmp.ne.s32.totalorder %s5639_s19, %s4917_s23  ;;  %p4922_p12 = scmp.lt.u32.totalorder %s5639_s19, %s5726_s29 }
 0x5cc   : > { %p4923_p13 = scmp.lt.u32.totalorder %s4921_s12, %s4917_s23  ;;  %p4925_p8 = scmp.lt.u32.totalorder %s4917_s23, %s5639_s19 }
 0x5cd   : > { %p4919_p5 = pnand %p4918_p6, %p5727_p7 }
 0x5ce   : > { %p4924_p0 = por %p4923_p13, %p4922_p12 }
 0x5cf   : > { %p4920_p11 = pneg %p4919_p5 }
 0x5d0   : > { %p4926_p9 = por %p4925_p8, %p4924_p0 }
 0x5d2   : > { %p4927_p10 = pnand %p4926_p9, %p4920_p11 }
 0x5d4   : > { %4930 = shalt.err (!%p4927_p10)
}
 0x5d5   : > { %s4997_s7 = smov 128   ;;  %s4998_s13 = smov 8  }
 0x5d6   : > { %4373 = dma.vmem_to_hbm [thread:$0]  (%p5727_p7), %s5634_s14, 256, %s5639_s19, %s3690_s21, %s4997_s7, %s4997_s7, %s4998_s13  }
 0x5d7 PF: > { %s5728_s10 = sld [smem:[#allocation19_spill]]  ;;  %s5729_s22 = sld [smem:[#allocation23_spill]] }
 0x5dd   : > { %s3718_s8 = sand.u32 1, %s5728_s10   ;;  %p5730_p1 = scmp.ne.s32.totalorder %s5729_s22, 0 }
 0x5de   : > { %s3719_s16 = scalar_lea.sflag [#allocation4], %s3718_s8 }
 0x5df   : > { %p4389_p3 = pnand %p3820_p4, %p5730_p1 }
 0x5e1   : > { %4960 = dma.done.wait (!%p4389_p3), %s3719_s16, 256  }
 0x5e2   : > { %4962 = vsyncadd (!%p4389_p3), %s3719_s16, 4294967040  ;;  %s5731_s27 = sld [smem:[#allocation20_spill]]  ;;  %s5732_s17 = sld [smem:[#allocation21_spill]] }
 0x5e3   : > { %s5733_s24 = smov %s4969_s25  ;;  %s5734_s25 = smov %s4973_s26 }
 0x5e8   : > { %p22_p2 = scmp.ge.s32.totalorder %s5731_s27, 4   ;;  %s5735_s26 = smov %s5732_s17 }
 0x5ea   :  { %24 = sbr.rel (!%p22_p2) target bundleno = 10 (0xa), region = 114 }
 0x5f1   :  { %3724 = vsyncpa [#allocation3], 1 }
 0x5f2   :  { %3726 = vsyncpa [#allocation3 + $0x1], 1 }
 0x5f3   :  { %3727 = vsyncpa [#allocation6], 1 }
 0x5f4   :  { %3728 = vsyncpa [#allocation9], 1 }
 0x5f5   :  { %3729 = vsyncpa [#allocation4], 1 }
 0x5f6   :  { %3731 = vsyncpa [#allocation4 + $0x1], 1 }

</bundles_post_ra>
